<compile_context>
chip_gen: v6e
topology: v6e:2x2x1
jax: 0.10.0
libtpu: 0.0.40
codegen_flags: <defaults>
</compile_context>

<pallas_src>
import numpy as np
import jax
import jax.numpy as jnp
from jax.experimental import pallas as pl
from jax.experimental.pallas import tpu as pltpu

# ----------------------------- static config (the "opt") ---------------------
L_2D = 4                                # opt.arch.posenc.L_2D
ENC_DIM = 2 + 4 * L_2D                  # = 18 (coord + sin/cos octaves)
PE_PAD = 24                             # encoding rows padded to a multiple of 8
HIDDEN = 64                             # opt.arch.layers hidden width
SKIP = (2,)                             # opt.arch.skip
BARF_C2F = (0.1, 0.5)                   # opt.barf_c2f
# layer dims after util.get_layer_dims + skip handling:
#   li=0: 18 -> 64, li=1: 64 -> 64, li=2 (skip): 64+18 -> 64, li=3: 64 -> 3
LAYER_DIMS = [(ENC_DIM, HIDDEN),
              (HIDDEN, HIDDEN),
              (HIDDEN + ENC_DIM, HIDDEN),
              (HIDDEN, 3)]

FREQ_NP = (2.0 ** np.arange(L_2D, dtype=np.float32)) * np.pi  # reference only

TM_MAX = 4096   # rows per grid step (lane axis); must be a multiple of 128


def _cdiv(a, b):
    return -(-a // b)


def _choose_tile(R):
    """Largest lane-multiple tile <= TM_MAX that still leaves >= 2 grid steps
    when R allows; nudge the step count to an even number so v7x's 2
    TensorCores both get work on the 'parallel' grid axis."""
    tm = TM_MAX
    while tm > 128 and R <= tm:
        tm //= 2
    n = _cdiv(R, tm)
    if n > 1 and n % 2 == 1:
        n2 = n + 1
        tm2 = _cdiv(_cdiv(R, n2), 128) * 128
        if tm2 >= 128 and _cdiv(R, tm2) == n2:
            tm = tm2
    return tm


# ----------------------------- Pallas kernel ---------------------------------
def nif_kernel(coord_ref, wenc_ref, w1_ref, w2f_ref, w3_ref, b_ref, out_ref):
    coord = coord_ref[...]                           # (2, TM) f32: row0=x, row1=y
    tm = coord.shape[1]

    # Positional encoding: sin/cos of coord * pi * 2^k, k = 0..L-1.
    # Two transcendental evaluations; higher octaves via double angle (f32).
    s = jnp.sin(coord * np.pi)                       # (2, TM)
    c = jnp.cos(coord * np.pi)
    sins = [s]
    coss = [c]
    for _ in range(L_2D - 1):
        s, c = 2.0 * s * c, 2.0 * c * c - 1.0
        sins.append(s)
        coss.append(c)
    ones = jnp.ones((1, tm), jnp.float32)            # carries b0 / b2 (bias fold)
    zeros = jnp.zeros((PE_PAD - ENC_DIM - 1, tm), jnp.float32)
    # channel-major encoding (24, TM); BARF c2f weights are pre-folded into the
    # matching encoder weight columns in the wrapper.
    pe = jnp.concatenate([coord] + sins + coss + [ones, zeros], axis=0)
    pe_b = pe.astype(jnp.bfloat16)

    # Stacked encoder GEMM: rows 0:64 -> layer-0 preact (+b0 via ones row),
    # rows 64:128 -> layer-2 skip-encoder contribution (+b2 via ones row).
    enc = jnp.dot(wenc_ref[...], pe_b,
                  preferred_element_type=jnp.float32)        # (128, TM) f32

    b1 = b_ref[:, 0:1]                                       # (64, 1) f32
    b3 = b_ref[0:3, 1:2]                                     # (3, 1)  f32

    # layer 0
    h = jnp.maximum(enc[:HIDDEN, :], 0.0)                    # (64, TM) f32
    # layer 1
    h = jnp.maximum(
        jnp.dot(w1_ref[...], h.astype(jnp.bfloat16),
                preferred_element_type=jnp.float32) + b1, 0.0)
    # layer 2 (skip): W2f @ h + (W2ce @ pe + b2) — encoder part precomputed above
    h = jnp.maximum(
        jnp.dot(w2f_ref[...], h.astype(jnp.bfloat16),
                preferred_element_type=jnp.float32) + enc[HIDDEN:, :], 0.0)
    # layer 3 + sigmoid
    logits = jnp.dot(w3_ref[...], h.astype(jnp.bfloat16),
                     preferred_element_type=jnp.float32) + b3
    out_ref[...] = pl.reciprocal(1.0 + jnp.exp(-logits), approx=True)  # (3, TM)


# ----------------------------- wrapper ---------------------------------------
def _pack_params(params, w_c2f):
    """Transpose weights to channel-major, permute encoder channels to the
    kernel order, fold the BARF c2f weights + biases b0/b2 into the stacked
    encoder weight, cast matmul weights to bf16, pack the remaining biases."""
    (w0, b0), (w1, b1), (w2, b2), (w3, b3) = params

    # kernel enc-row order (after the 2 coord rows):
    #   for f in (sin, cos): for k in 0..L-1: for cc in (x, y)
    # PyTorch flatten order: orig = cc*(2L) + f*L + k
    perm = np.array([cc * (2 * L_2D) + f * L_2D + k
                     for f in (0, 1) for k in range(L_2D) for cc in (0, 1)],
                    dtype=np.int32)
    wfold = jnp.tile(w_c2f, 4)                        # orig channel i -> w_c2f[i % L]
    kpad = PE_PAD - ENC_DIM - 1                       # zero rows after the ones row

    # layer-0 weight in kernel K-order + bias row + zero pad  -> (24, 64)
    w0_enc = (w0[2:, :] * wfold[:, None])[perm, :]
    w0_km = jnp.concatenate(
        [w0[:2, :], w0_enc, b0.reshape(1, HIDDEN),
         jnp.zeros((kpad, HIDDEN), jnp.float32)], axis=0)
    # layer-2 skip-encoder weight, same layout
    w2_enc = (w2[HIDDEN + 2:, :] * wfold[:, None])[perm, :]
    w2_km = jnp.concatenate(
        [w2[HIDDEN:HIDDEN + 2, :], w2_enc, b2.reshape(1, HIDDEN),
         jnp.zeros((kpad, HIDDEN), jnp.float32)], axis=0)

    wenc = jnp.concatenate([w0_km.T, w2_km.T], axis=0).astype(jnp.bfloat16)  # (128,24)
    w1_t = w1.T.astype(jnp.bfloat16)                                         # (64, 64)
    w2f_t = w2[:HIDDEN, :].T.astype(jnp.bfloat16)                            # (64, 64)
    w3_t = w3.T.astype(jnp.bfloat16)                                         # (3, 64)

    b_pack = jnp.zeros((HIDDEN, 2), jnp.float32)
    b_pack = b_pack.at[:, 0].set(b1.reshape(-1))
    b_pack = b_pack.at[:3, 1].set(b3.reshape(-1))
    return wenc, w1_t, w2f_t, w3_t, b_pack


def _forward(coord_2D, params, progress):
    """coord_2D: (B, N, 2) f32 -> rgb (B, N, 3) f32."""
    B, N, _ = coord_2D.shape
    R = B * N
    tm = _choose_tile(R)
    n_tiles = _cdiv(R, tm)
    rp = n_tiles * tm

    coord_cm = coord_2D.reshape(R, 2).T              # (2, R), channel-major
    if rp != R:
        coord_cm = jnp.pad(coord_cm, ((0, 0), (0, rp - R)))

    # BARF coarse-to-fine per-octave weights (scalar glue, stays in JAX).
    start, end = BARF_C2F
    alpha = (progress - start) / (end - start) * L_2D
    k = jnp.arange(L_2D, dtype=jnp.float32)
    w_c2f = (1.0 - jnp.cos(jnp.clip(alpha - k, 0.0, 1.0) * jnp.pi)) / 2.0

    weights = _pack_params(params, w_c2f)

    def _const_spec(a):
        return pl.BlockSpec(a.shape, lambda i: (0, 0))

    out = pl.pallas_call(
        nif_kernel,
        out_shape=jax.ShapeDtypeStruct((3, rp), jnp.float32),
        grid_spec=pltpu.PrefetchScalarGridSpec(
            num_scalar_prefetch=0,
            grid=(n_tiles,),
            in_specs=[pl.BlockSpec((2, tm), lambda i: (0, i))]
                     + [_const_spec(a) for a in weights],
            out_specs=pl.BlockSpec((3, tm), lambda i: (0, i)),
        ),
        compiler_params=pltpu.CompilerParams(
            dimension_semantics=("parallel",),
            vmem_limit_bytes=64 * 1024 * 1024),
    )(coord_cm, *weights)

    return out[:, :R].T.reshape(B, N, 3)


# jit so the channel-major transposes fuse into the same compiled program.
neural_image_function = jax.jit(_forward)


# ----------------------------- deterministic params --------------------------
def init_params(key):
    """Mimic torch.nn.Linear init: U(-1/sqrt(fan_in), 1/sqrt(fan_in)).
    Layer 0 weight & bias scaled by sqrt(input_2D_dim/2) (barf_c2f branch)."""
    params = []
    for li, (k_in, k_out) in enumerate(LAYER_DIMS):
        key, kw, kb = jax.random.split(key, 3)
        bound = 1.0 / np.sqrt(k_in)
        w = jax.random.uniform(kw, (k_in, k_out), jnp.float32, -bound, bound)
        b = jax.random.uniform(kb, (1, k_out), jnp.float32, -bound, bound)
        if li == 0:
            scale = np.sqrt(ENC_DIM / 2.0)
            w = w * scale
            b = b * scale
        params.append((w, b))
    return params


# ----------------------------- pure-JAX reference -----------------------------
def reference_forward(coord_2D, params, progress):
    B, N, _ = coord_2D.shape
    c = coord_2D.reshape(-1, 2)
    freq = jnp.asarray(FREQ_NP)
    spec = c[..., None] * freq                               # (R, 2, L)
    enc = jnp.stack([jnp.sin(spec), jnp.cos(spec)], axis=-2) # (R, 2, 2, L)
    enc = enc.reshape(c.shape[0], -1)                        # (R, 4L)
    start, end = BARF_C2F
    alpha = (progress - start) / (end - start) * L_2D
    k = jnp.arange(L_2D, dtype=jnp.float32)
    w = (1.0 - jnp.cos(jnp.clip(alpha - k, 0.0, 1.0) * jnp.pi)) / 2.0
    enc = (enc.reshape(-1, L_2D) * w).reshape(enc.shape)
    points_enc = jnp.concatenate([c, enc], axis=-1)
    feat = points_enc
    for li, (wmat, bvec) in enumerate(params):
        if li in SKIP:
            feat = jnp.concatenate([feat, points_enc], axis=-1)
        feat = feat @ wmat + bvec
        if li != len(params) - 1:
            feat = jax.nn.relu(feat)
    return jax.nn.sigmoid(feat).reshape(B, N, 3)


# ----------------------------- main -------------------------------------------
if __name__ == "__main__":
    key = jax.random.PRNGKey(0)
    k_coord, k_params = jax.random.split(key)

    B, N = 2, 512
    coord_2D = jax.random.uniform(k_coord, (B, N, 2), jnp.float32, -1.0, 1.0)
    params = init_params(k_params)
    # self.progress is a learnable scalar Parameter (init 0.0); use a mid-training
    # value so all four octaves are exercised (last one partially weighted).
    progress = jnp.float32(0.42)

    rgb = neural_image_function(coord_2D, params, progress)
    rgb = jax.block_until_ready(rgb)

    ref = reference_forward(coord_2D, params, progress)
    # Tolerance reflects bf16 MXU operands + double-angle encoding + approx
    # reciprocal in the sigmoid; output is a post-sigmoid RGB in [0, 1], so
    # absolute error stays well below these bounds.
    np.testing.assert_allclose(np.asarray(rgb), np.asarray(ref),
                               rtol=2e-2, atol=2e-2)
    assert rgb.shape == (B, N, 3)
    print("KERNEL_OK")
</pallas_src>

<mosaic_0001>
module attributes {stable_mosaic.version = 11 : i64} {
  func.func @nif_kernel(%arg0: i32, %arg1: memref<2x512xf32, #tpu.memory_space<vmem>>, %arg2: memref<128x24xbf16, #tpu.memory_space<vmem>>, %arg3: memref<64x64xbf16, #tpu.memory_space<vmem>>, %arg4: memref<64x64xbf16, #tpu.memory_space<vmem>>, %arg5: memref<3x64xbf16, #tpu.memory_space<vmem>>, %arg6: memref<64x2xf32, #tpu.memory_space<vmem>>, %arg7: memref<3x512xf32, #tpu.memory_space<vmem>>) attributes {dimension_semantics = [#tpu.dimension_semantics<parallel>], iteration_bounds = array<i64: 2>, scalar_prefetch = 0 : i64, scratch_operands = 0 : i64, tpu.core_type = #tpu.core_type<tc>, window_params = [{transform_indices = @transform_0, window_bounds = array<i64: 2, 512>}, {pipeline_mode = #tpu.pipeline_mode<synchronous>, transform_indices = @transform_1, window_bounds = array<i64: 128, 24>}, {pipeline_mode = #tpu.pipeline_mode<synchronous>, transform_indices = @transform_2, window_bounds = array<i64: 64, 64>}, {pipeline_mode = #tpu.pipeline_mode<synchronous>, transform_indices = @transform_3, window_bounds = array<i64: 64, 64>}, {pipeline_mode = #tpu.pipeline_mode<synchronous>, transform_indices = @transform_4, window_bounds = array<i64: 3, 64>}, {pipeline_mode = #tpu.pipeline_mode<synchronous>, transform_indices = @transform_5, window_bounds = array<i64: 64, 2>}, {transform_indices = @transform_6, window_bounds = array<i64: 3, 512>}]} {
    %c0 = arith.constant 0 : index
    %c0_0 = arith.constant 0 : index
    %0 = vector.load %arg1[%c0, %c0_0] : memref<2x512xf32, #tpu.memory_space<vmem>>, vector<2x512xf32>
    %cst = arith.constant 3.14159274 : f32
    %1 = vector.broadcast %cst : f32 to vector<2x512xf32>
    %2 = arith.mulf %0, %1 : vector<2x512xf32>
    %3 = math.sin %2 : vector<2x512xf32>
    %cst_1 = arith.constant 3.14159274 : f32
    %4 = vector.broadcast %cst_1 : f32 to vector<2x512xf32>
    %5 = arith.mulf %0, %4 : vector<2x512xf32>
    %6 = math.cos %5 : vector<2x512xf32>
    %cst_2 = arith.constant 2.000000e+00 : f32
    %7 = vector.broadcast %cst_2 : f32 to vector<2x512xf32>
    %8 = arith.mulf %7, %3 : vector<2x512xf32>
    %9 = arith.mulf %8, %6 : vector<2x512xf32>
    %cst_3 = arith.constant 2.000000e+00 : f32
    %10 = vector.broadcast %cst_3 : f32 to vector<2x512xf32>
    %11 = arith.mulf %10, %6 : vector<2x512xf32>
    %12 = arith.mulf %11, %6 : vector<2x512xf32>
    %cst_4 = arith.constant 1.000000e+00 : f32
    %13 = vector.broadcast %cst_4 : f32 to vector<2x512xf32>
    %14 = arith.subf %12, %13 : vector<2x512xf32>
    %cst_5 = arith.constant 2.000000e+00 : f32
    %15 = vector.broadcast %cst_5 : f32 to vector<2x512xf32>
    %16 = arith.mulf %15, %9 : vector<2x512xf32>
    %17 = arith.mulf %16, %14 : vector<2x512xf32>
    %cst_6 = arith.constant 2.000000e+00 : f32
    %18 = vector.broadcast %cst_6 : f32 to vector<2x512xf32>
    %19 = arith.mulf %18, %14 : vector<2x512xf32>
    %20 = arith.mulf %19, %14 : vector<2x512xf32>
    %cst_7 = arith.constant 1.000000e+00 : f32
    %21 = vector.broadcast %cst_7 : f32 to vector<2x512xf32>
    %22 = arith.subf %20, %21 : vector<2x512xf32>
    %cst_8 = arith.constant 2.000000e+00 : f32
    %23 = vector.broadcast %cst_8 : f32 to vector<2x512xf32>
    %24 = arith.mulf %23, %17 : vector<2x512xf32>
    %25 = arith.mulf %24, %22 : vector<2x512xf32>
    %cst_9 = arith.constant 2.000000e+00 : f32
    %26 = vector.broadcast %cst_9 : f32 to vector<2x512xf32>
    %27 = arith.mulf %26, %22 : vector<2x512xf32>
    %28 = arith.mulf %27, %22 : vector<2x512xf32>
    %cst_10 = arith.constant 1.000000e+00 : f32
    %29 = vector.broadcast %cst_10 : f32 to vector<2x512xf32>
    %30 = arith.subf %28, %29 : vector<2x512xf32>
    %cst_11 = arith.constant 1.000000e+00 : f32
    %31 = vector.broadcast %cst_11 : f32 to vector<1x512xf32>
    %cst_12 = arith.constant 0.000000e+00 : f32
    %32 = vector.broadcast %cst_12 : f32 to vector<5x512xf32>
    %33 = tpu.concatenate %0, %3, %9, %17, %25, %6, %14, %22, %30, %31, %32 in 0 : vector<2x512xf32>, vector<2x512xf32>, vector<2x512xf32>, vector<2x512xf32>, vector<2x512xf32>, vector<2x512xf32>, vector<2x512xf32>, vector<2x512xf32>, vector<2x512xf32>, vector<1x512xf32>, vector<5x512xf32> -> vector<24x512xf32>
    %34 = arith.truncf %33 : vector<24x512xf32> to vector<24x512xbf16>
    %c0_13 = arith.constant 0 : index
    %c0_14 = arith.constant 0 : index
    %35 = vector.load %arg2[%c0_13, %c0_14] : memref<128x24xbf16, #tpu.memory_space<vmem>>, vector<128x24xbf16>
    %cst_15 = arith.constant dense<0.000000e+00> : vector<128x512xf32>
    %36 = tpu.matmul %35, %34, %cst_15 {dimension_numbers = #tpu.dot_dimension_numbers<[1], [0], [0], [1], [0, 0, 1, 1], [], []>} : vector<128x24xbf16>, vector<24x512xbf16>, vector<128x512xf32> -> vector<128x512xf32>
    %c0_16 = arith.constant 0 : index
    %c0_17 = arith.constant 0 : index
    %37 = vector.load %arg6[%c0_16, %c0_17] : memref<64x2xf32, #tpu.memory_space<vmem>>, vector<64x1xf32>
    %c0_18 = arith.constant 0 : index
    %c1 = arith.constant 1 : index
    %38 = vector.load %arg6[%c0_18, %c1] : memref<64x2xf32, #tpu.memory_space<vmem>>, vector<3x1xf32>
    %39 = vector.extract_strided_slice %36 {offsets = [0, 0], sizes = [64, 512], strides = [1, 1]} : vector<128x512xf32> to vector<64x512xf32>
    %cst_19 = arith.constant 0.000000e+00 : f32
    %40 = vector.broadcast %cst_19 : f32 to vector<64x512xf32>
    %41 = arith.maximumf %39, %40 : vector<64x512xf32>
    %c0_20 = arith.constant 0 : index
    %c0_21 = arith.constant 0 : index
    %42 = vector.load %arg3[%c0_20, %c0_21] : memref<64x64xbf16, #tpu.memory_space<vmem>>, vector<64x64xbf16>
    %43 = arith.truncf %41 : vector<64x512xf32> to vector<64x512xbf16>
    %cst_22 = arith.constant dense<0.000000e+00> : vector<64x512xf32>
    %44 = tpu.matmul %42, %43, %cst_22 {dimension_numbers = #tpu.dot_dimension_numbers<[1], [0], [0], [1], [0, 0, 1, 1], [], []>} : vector<64x64xbf16>, vector<64x512xbf16>, vector<64x512xf32> -> vector<64x512xf32>
    %45 = vector.broadcast %37 : vector<64x1xf32> to vector<64x512xf32>
    %46 = arith.addf %44, %45 : vector<64x512xf32>
    %cst_23 = arith.constant 0.000000e+00 : f32
    %47 = vector.broadcast %cst_23 : f32 to vector<64x512xf32>
    %48 = arith.maximumf %46, %47 : vector<64x512xf32>
    %c0_24 = arith.constant 0 : index
    %c0_25 = arith.constant 0 : index
    %49 = vector.load %arg4[%c0_24, %c0_25] : memref<64x64xbf16, #tpu.memory_space<vmem>>, vector<64x64xbf16>
    %50 = arith.truncf %48 : vector<64x512xf32> to vector<64x512xbf16>
    %cst_26 = arith.constant dense<0.000000e+00> : vector<64x512xf32>
    %51 = tpu.matmul %49, %50, %cst_26 {dimension_numbers = #tpu.dot_dimension_numbers<[1], [0], [0], [1], [0, 0, 1, 1], [], []>} : vector<64x64xbf16>, vector<64x512xbf16>, vector<64x512xf32> -> vector<64x512xf32>
    %52 = vector.extract_strided_slice %36 {offsets = [64, 0], sizes = [64, 512], strides = [1, 1]} : vector<128x512xf32> to vector<64x512xf32>
    %53 = arith.addf %51, %52 : vector<64x512xf32>
    %cst_27 = arith.constant 0.000000e+00 : f32
    %54 = vector.broadcast %cst_27 : f32 to vector<64x512xf32>
    %55 = arith.maximumf %53, %54 : vector<64x512xf32>
    %c0_28 = arith.constant 0 : index
    %c0_29 = arith.constant 0 : index
    %56 = vector.load %arg5[%c0_28, %c0_29] : memref<3x64xbf16, #tpu.memory_space<vmem>>, vector<3x64xbf16>
    %57 = arith.truncf %55 : vector<64x512xf32> to vector<64x512xbf16>
    %cst_30 = arith.constant dense<0.000000e+00> : vector<3x512xf32>
    %58 = tpu.matmul %56, %57, %cst_30 {dimension_numbers = #tpu.dot_dimension_numbers<[1], [0], [0], [1], [0, 0, 1, 1], [], []>} : vector<3x64xbf16>, vector<64x512xbf16>, vector<3x512xf32> -> vector<3x512xf32>
    %59 = vector.broadcast %38 : vector<3x1xf32> to vector<3x512xf32>
    %60 = arith.addf %58, %59 : vector<3x512xf32>
    %cst_31 = arith.constant 0.000000e+00 : f32
    %61 = vector.broadcast %cst_31 : f32 to vector<3x512xf32>
    %62 = arith.subf %61, %60 : vector<3x512xf32>
    %63 = math.exp %62 : vector<3x512xf32>
    %cst_32 = arith.constant 1.000000e+00 : f32
    %64 = vector.broadcast %cst_32 : f32 to vector<3x512xf32>
    %65 = arith.addf %64, %63 : vector<3x512xf32>
    %66 = tpu.reciprocal %65 {approx = true} : vector<3x512xf32> -> vector<3x512xf32>
    %c0_33 = arith.constant 0 : index
    %c0_34 = arith.constant 0 : index
    %67 = vector.load %arg7[%c0_33, %c0_34] : memref<3x512xf32, #tpu.memory_space<vmem>>, vector<3x512xf32>
    tpu.vector_store %arg7[%c0_33, %c0_34], %66 {strides = array<i32>} : memref<3x512xf32, #tpu.memory_space<vmem>>, vector<3x512xf32>,
    return
  }
  func.func @transform_0(%arg0: i32) -> (i32, i32) {
    %c0_i32 = arith.constant 0 : i32
    %c0_i32_0 = arith.constant 0 : i32
    return %c0_i32, %arg0 : i32, i32
  }
  func.func @transform_1(%arg0: i32) -> (i32, i32) {
    %c0_i32 = arith.constant 0 : i32
    %c0_i32_0 = arith.constant 0 : i32
    %c0_i32_1 = arith.constant 0 : i32
    return %c0_i32, %c0_i32_0 : i32, i32
  }
  func.func @transform_2(%arg0: i32) -> (i32, i32) {
    %c0_i32 = arith.constant 0 : i32
    %c0_i32_0 = arith.constant 0 : i32
    %c0_i32_1 = arith.constant 0 : i32
    return %c0_i32, %c0_i32_0 : i32, i32
  }
  func.func @transform_3(%arg0: i32) -> (i32, i32) {
    %c0_i32 = arith.constant 0 : i32
    %c0_i32_0 = arith.constant 0 : i32
    %c0_i32_1 = arith.constant 0 : i32
    return %c0_i32, %c0_i32_0 : i32, i32
  }
  func.func @transform_4(%arg0: i32) -> (i32, i32) {
    %c0_i32 = arith.constant 0 : i32
    %c0_i32_0 = arith.constant 0 : i32
    %c0_i32_1 = arith.constant 0 : i32
    return %c0_i32, %c0_i32_0 : i32, i32
  }
  func.func @transform_5(%arg0: i32) -> (i32, i32) {
    %c0_i32 = arith.constant 0 : i32
    %c0_i32_0 = arith.constant 0 : i32
    %c0_i32_1 = arith.constant 0 : i32
    return %c0_i32, %c0_i32_0 : i32, i32
  }
  func.func @transform_6(%arg0: i32) -> (i32, i32) {
    %c0_i32 = arith.constant 0 : i32
    %c0_i32_0 = arith.constant 0 : i32
    return %c0_i32, %arg0 : i32, i32
  }
}

</mosaic_0001>

<bundles_post_ra>
// kernel: tile.9
= control target key start
LH: loop header
LB: loop body
LE: loop exit
PB: predicated region body
PF: predicated region fallthrough
CT: control target
= control target key end

     0   :  { %s22_s0 = inlined_call_operand.vmem [shape: f32[4], index: 0, kind: input, shape index: {}]   ;;  %s23_s1 = inlined_call_operand.vmem [shape: f32[4,4], index: 1, kind: output, shape index: {}]  }
   0x1   :  { %v4_v0 = vld [vmem:[%s22_s0] ss:$0 sm:$0xff] }
   0x2   :  { %5 = vst [vmem:[%s23_s1] sm:$0xf] %v4_v0 }

// kernel: mul.13
= control target key start
LH: loop header
LB: loop body
LE: loop exit
PB: predicated region body
PF: predicated region fallthrough
CT: control target
= control target key end

     0   :  { %vm8_vm0 = vcmask 31744   ;;  %s40_s8 = smov 4   ;;  %s41_s9 = smov 8   ;;  %vm14_vm1 = vcmask 130144   ;;  %vm20_vm2 = vcmask 97344   ;;  %vm26_vm3 = vcmask 64544   ;;  %s58_s0 = inlined_call_operand.vmem [shape: f32[4,4], index: 0, kind: input, shape index: {}]   ;;  %s59_s1 = inlined_call_operand.vmem [shape: f32[16], index: 1, kind: output, shape index: {}]  }
   0x1   :  { %v5_v0 = vld [vmem:[%s58_s0] sm:$0xf]  ;;  %s39_s0 = smov 12  }
   0x2   :  { %6 = vst [vmem:[#allocation1] sm:$0xf] %v5_v0 }
   0x9   :  { %v11_v1 = vld [vmem:[#allocation1 + $0x3] sm:$0x1]   ;;  %v23_v2 = vld [vmem:[#allocation1 + $0x1] sm:$0x1]   ;;  %v7_v3 = vld [vmem:[#allocation1] sm:$0x1]  }
   0xa   :  { %12 = vrot.lane.b32.xlu0 %v11_v1, %s39_s0  ;;  %24 = vrot.lane.b32.xlu1 %v23_v2, %s40_s8  ;;  %v17_v4 = vld [vmem:[#allocation1 + $0x2] sm:$0x1]   ;;  %9 = vst.msk [vmem:[#allocation0] sm:$0x1] %vm8_vm0, %v7_v3  }
   0xe   :  { %18 = vrot.lane.b32.xlu0 %v17_v4, %s41_s9 }
  0x7c   :  { %v13_v5 = vpop.permute.xlu0 %12   ;;  %v25_v6 = vpop.permute.xlu1 %24  }
  0x7d   :  { %15 = vst.msk [vmem:[#allocation0] sm:$0x1] %vm14_vm1, %v13_v5  }
  0x80   :  { %v19_v7 = vpop.permute.xlu0 %18  }
  0x81   :  { %21 = vst.msk [vmem:[#allocation0] sm:$0x1] %vm20_vm2, %v19_v7  }
  0x82   :  { %27 = vst.msk [vmem:[#allocation0] sm:$0x1] %vm26_vm3, %v25_v6  }
  0x89   :  { %v32_v8 = vld [vmem:[#allocation0] sm:$0x1] }
  0x8a   :  { %35 = vst [vmem:[%s59_s1] sm:$0x1] %v32_v8 }

// kernel: _forward.1
= control target key start
LH: loop header
LB: loop body
LE: loop exit
PB: predicated region body
PF: predicated region fallthrough
CT: control target
= control target key end

     0   :  { %s1971_s21 = smov 0   ;;  %s2478_s0 = inlined_call_operand.vmem [shape: f32[2,1024], index: 0, kind: input, shape index: {}]   ;;  %s2479_s1 = inlined_call_operand.vmem [shape: bf16[128,24], index: 1, kind: input, shape index: {}]   ;;  %s2480_s2 = inlined_call_operand.vmem [shape: bf16[64,64], index: 2, kind: input, shape index: {}]   ;;  %s2481_s3 = inlined_call_operand.vmem [shape: bf16[64,64], index: 3, kind: input, shape index: {}]   ;;  %s2482_s4 = inlined_call_operand.vmem [shape: bf16[3,64], index: 4, kind: input, shape index: {}]   ;;  %s2483_s5 = inlined_call_operand.vmem [shape: f32[64,2], index: 5, kind: input, shape index: {}]   ;;  %s2484_s6 = inlined_call_operand.vmem [shape: f32[3,1024], index: 6, kind: output, shape index: {}]  }
   0x1 LB: > { %s1784_s22 = sadd.s32 4294967295, %s1925_s21   ;;  %p1788_p0 = scmp.ge.s32.totalorder %s1925_s21, 1  ;;  %s1925_s21 = sphi %s1971_s21, %s16_s21  }
   0x2   : > { %p213_p1 = scmp.lt.s32.totalorder %s1925_s21, 3 }
   0x4   : > { %p214_p2 = pnand %p1788_p0, %p213_p1 }
   0x6   : > { %217 = sbr.rel (%p214_p2) target bundleno = 1106 (0x452), region = 44 }
   0xb   : > { %s1789_s23 = sshll.u32 %s1784_s22, 2  ;;  %v2485_v0 = vmov 0   ;;  %v1928_v14 = vmov 683565275   ;;  %v1929_v16 = vmov 2475754826  }
   0xc   : > { %p244_p3 = scmp.lt.s32.totalorder %s1789_s23, 7  ;;  %847 = vmatprep.mubr.bf16.mxu0 %v2485_v0  ;;  %960 = vmatprep.mubr.bf16.mxu1 %v2485_v0  ;;  %v1930_v18 = vmov 2131351028   ;;  %v1931_v20 = vmov 2102212464  }
   0xd   : > { %1880 = vset.pattern.permute.xlu1 %v2485_v0  ;;  %1879 = vset.pattern.permute.xlu0 %v2485_v0  ;;  %v1932_v22 = vmov 920167782   ;;  %v1933_v29 = vmov 1326507024  }
   0xe   : > { %s2541_s23 = smov (!%p244_p3, %s1789_s23), 7 }
   0xf   : > { %s1790_s24 = sshll.u32 %s2541_s23, 1  ;;  %s1792_s12 = sshll.u32 %s2541_s23, 2 }
  0x10   : > { %s247_s27 = scalar_lea.vmem %s2478_s0, %s1790_s24  ;;  %s253_s15 = scalar_lea.vmem %s2484_s6, %s1792_s12 }
  0x11   : > { %v1989_v1 = vld [vmem:[%s247_s27] sm:$0xff] }
  0x12   : > { %v1992_v2 = vmul.f32 3.1415927, %v1989_v1 }
  0x14   : > { %v258_v3 = vand.u32 2147483647, %v1992_v2  ;;  %v261_v4 = vand.u32 2139095040, %v1992_v2  ;;  %vm260_vm7 = vcmp.lt.s32.totalorder %v1992_v2, 0  ;;  %vm350_vm15 = vweird.f32 %v1992_v2 }
  0x16   : > { %v262_v5 = vshrl.u32 %v261_v4, 23  ;;  %v265_v6 = vand.u32 8388607, %v258_v3  ;;  %vm259_vm8 = vcmp.le.f32.partialorder %v258_v3, 0.7853982  ;;  %v481_v3 = vcombine.high %v1989_v1, %v1989_v1 }
  0x18   : > { %v1793_v7 = vadd.s32 4294967169, %v262_v5  ;;  %v266_v11 = vor.u32 8388608, %v265_v6 }
  0x1a   : > { %v268_v8 = vadd.s32 1, %v1793_v7  ;;  %v306_v31 = vshll.u32 %v266_v11, 8 }
  0x1c   : > { %vm269_vm0 = vcmp.gt.s32.totalorder %v268_v8, 0 }
  0x1d   : > { %v270_v9 = vsel %vm269_vm0, %v268_v8, 0  ;;  %vm678_vm0 = vcmask 1041408  }
  0x1e   : > { %v272_v10 = vand.u32 31, %v270_v9  ;;  %v271_v12 = vshrl.u32 %v270_v9, 5 }
  0x20   : > { %v273_v13 = vsub.s32 32, %v272_v10  ;;  %v275_v15 = vshll.u32 %v1928_v14, %v272_v10  ;;  %v278_v17 = vshll.u32 %v1929_v16, %v272_v10  ;;  %v281_v19 = vshll.u32 %v1930_v18, %v272_v10 }
  0x21   : > { %v284_v21 = vshll.u32 %v1931_v20, %v272_v10  ;;  %v287_v23 = vshll.u32 %v1932_v22, %v272_v10  ;;  %vm290_vm1 = vcmp.lt.s32.totalorder %v271_v12, 1  ;;  %vm293_vm2 = vcmp.lt.s32.totalorder %v271_v12, 4 }
  0x22   : > { %v274_v24 = vshrl.u32 %v1928_v14, %v273_v13  ;;  %v276_v25 = vshrl.u32 %v1929_v16, %v273_v13  ;;  %v279_v26 = vshrl.u32 %v1930_v18, %v273_v13  ;;  %v282_v27 = vshrl.u32 %v1931_v20, %v273_v13 }
  0x23   : > { %v285_v28 = vshrl.u32 %v1932_v22, %v273_v13  ;;  %v288_v30 = vshrl.u32 %v1933_v29, %v273_v13  ;;  %vm291_vm3 = vcmp.lt.s32.totalorder %v271_v12, 2  ;;  %vm292_vm4 = vcmp.lt.s32.totalorder %v271_v12, 3 }
  0x24   : > { %v277_v32 = vor.u32 %v276_v25, %v275_v15  ;;  %v280_v33 = vor.u32 %v279_v26, %v278_v17  ;;  %v283_v34 = vor.u32 %v282_v27, %v281_v19  ;;  %v1934_v25 = vmov 1983009808  }
  0x25   : > { %v286_v35 = vor.u32 %v285_v28, %v284_v21  ;;  %v289_v36 = vor.u32 %v288_v30, %v287_v23  ;;  %v483_v26 = vunpack.c.l.s4 %v1934_v25  ;;  %v485_v27 = vlaneseq }
  0x26   : > { %v294_v37 = vsel %vm290_vm1, %v274_v24, %v277_v32  ;;  %v295_v38 = vsel %vm293_vm2, %v283_v34, 2102212464  ;;  %v298_v39 = vsel %vm290_vm1, %v277_v32, %v280_v33  ;;  %v302_v40 = vsel %vm290_vm1, %v280_v33, %v283_v34 }
  0x27   : > { %v296_v41 = vsel %vm292_vm4, %v280_v33, %v295_v38  ;;  %v299_v42 = vsel %vm293_vm2, %v286_v35, 920167782  ;;  %v303_v43 = vsel %vm293_vm2, %v289_v36, 1326507024  ;;  %v484_v30 = vunpack.c.0.s8 %v483_v26 }
  0x28   : > { %v300_v44 = vsel %vm292_vm4, %v283_v34, %v299_v42  ;;  %v304_v45 = vsel %vm292_vm4, %v286_v35, %v303_v43  ;;  %v297_v46 = vsel %vm291_vm3, %v294_v37, %v296_v41  ;;  %vm683_vm1 = vcmask 1043456  }
  0x29   : > { %v301_v47 = vsel %vm291_vm3, %v298_v39, %v300_v44  ;;  %v305_v48 = vsel %vm291_vm3, %v302_v40, %v304_v45  ;;  %v313_v53 = vmul.u32 %v306_v31, %v297_v46  ;;  %vm688_vm2 = vcmask 1045504  }
  0x2a   : > { %v1998_v49 = vmul.u32.u64.low %v306_v31, %v305_v48  ;;  %v1999_v50 = vmul.u32.u64.high %v306_v31, %v305_v48, %v1998_v49  ;;  %v2001_v51 = vmul.u32.u64.low %v306_v31, %v301_v47  ;;  %v2002_v52 = vmul.u32.u64.high %v306_v31, %v301_v47, %v2001_v51 }
  0x2b   : > { %v486_v31 = vshrl.u32 %v485_v27, 7  ;;  %vm709_vm3 = vcmask 1042432   ;;  %vm778_vm4 = vcmask 195584  }
  0x2c   : > { %vm315_vm5 = vc.u32 %v1999_v50, %v2001_v51  ;;  %v316_v54 = vadd.s32 1, %v2002_v52  ;;  %v314_v5 = vadd.s32 %v2001_v51, %v1999_v50 }
  0x2d   : > { %v2014_v36 = vsub.s32 %v484_v30, %v486_v31 }
  0x2e   : > { %v317_v55 = vsel %vm315_vm5, %v316_v54, %v2002_v52  ;;  %vm1166_vm5 = vcmask 523264  }
  0x2f   : > { %v318_v56 = vadd.s32 %v317_v55, %v313_v53  ;;  %v488_v41 = vrot.slane %v1989_v1, %v2014_v36  ;;  %v495_v42 = vrot.slane %v481_v3, %v2014_v36 }
  0x31   : > { %v319_v57 = vadd.s32 536870912, %v318_v56  ;;  %v496_v50 = vcombine.high %v488_v41, %v488_v41  ;;  %v497_v51 = vcombine.high %v495_v42, %v495_v42 }
  0x33   : > { %v320_v58 = vshrl.u32 %v319_v57, 30 }
  0x35   : > { %v321_v59 = vshll.u32 %v320_v58, 30  ;;  %v344_v19 = vsub.s32 4, %v320_v58 }
  0x37   : > { %v322_v60 = vsub.s32 %v318_v56, %v321_v59  ;;  %v345_v22 = vsel %vm260_vm7, %v344_v19, %v320_v58 }
  0x38   : > { %v347_v23 = vsel %vm259_vm8, 0, %v345_v22 }
  0x39   : > { %v324_v61 = vsub.s32 0, %v322_v60  ;;  %v351_v24 = vadd.s32 3, %v347_v23  ;;  %v455_v28 = vand.u32 3, %v347_v23 }
  0x3b   : > { %v1794_v62 = vmin.u32 %v324_v61, %v322_v60  ;;  %v352_v29 = vand.u32 3, %v351_v24  ;;  %vm460_vm9 = vcmp.eq.s32.totalorder %v455_v28, 2  ;;  %vm457_vm11 = vcmp.eq.s32.totalorder %v455_v28, 0 }
  0x3c   : > { %vm456_vm13 = vcmp.lt.s32.totalorder %v455_v28, 2 }
  0x3d   : > { %v326_v63 = vclz %v1794_v62  ;;  %vm357_vm10 = vcmp.eq.s32.totalorder %v352_v29, 2  ;;  %vm354_vm12 = vcmp.eq.s32.totalorder %v352_v29, 0  ;;  %vm353_vm14 = vcmp.lt.s32.totalorder %v352_v29, 2 }
  0x3f   : > { %v1795_v4 = vadd.s32 4294967294, %v326_v63 }
  0x41   : > { %vm1796_vm6 = vcmp.lt.s32.totalorder %v1795_v4, 0 }
  0x42   : > { %v329_v6 = vsel %vm1796_vm6, 0, %v1795_v4 }
  0x43   : > { %v330_v7 = vsub.s32 32, %v329_v6  ;;  %v331_v8 = vshll.u32 %v322_v60, %v329_v6  ;;  %v334_v9 = vsub.s32 4294967266, %v329_v6 }
  0x45   : > { %v332_v10 = vshrl.u32 %v314_v5, %v330_v7  ;;  %v335_v11 = vadd.s32 127, %v334_v9 }
  0x47   : > { %v333_v12 = vor.u32 %v332_v10, %v331_v8  ;;  %v336_v13 = vshll.u32 %v335_v11, 23 }
  0x49   : > { %v337_v14 = vor.u32 4788187, %v336_v13  ;;  %v340_v15 = vcvt.s32.f32 %v333_v12 }
  0x4b   : > { %v338_v16 = vand.u32 2147483647, %v337_v14 }
  0x4d   : > { %v341_v17 = vmul.f32 %v340_v15, %v338_v16 }
  0x4f   : > { %v342_v18 = vxor.u32 2147483648, %v341_v17 }
  0x51   : > { %v343_v20 = vsel %vm260_vm7, %v342_v18, %v341_v17 }
  0x52   : > { %v346_v21 = vsel %vm259_vm8, %v1992_v2, %v343_v20 }
  0x53   : > { %1899 = vcosq.f32 %v346_v21 }
  0x54   : > { %1901 = vsinq.f32 %v346_v21 }
  0x60   : > { %v1900_v32 = vpop.eup %1899 }
  0x61   : > { %v1902_v33 = vpop.eup %1901  ;;  %v358_v34 = vxor.u32 2147483648, %v1900_v32 }
  0x62   : > { %v355_v35 = vxor.u32 2147483648, %v1902_v33 }
  0x63   : > { %v462_v37 = vsel %vm460_vm9, %v358_v34, %v1902_v33  ;;  %v359_v38 = vsel %vm357_vm10, %v358_v34, %v1902_v33 }
  0x64   : > { %v459_v39 = vsel %vm457_vm11, %v1900_v32, %v355_v35  ;;  %v356_v40 = vsel %vm354_vm12, %v1900_v32, %v355_v35 }
  0x65   : > { %v463_v43 = vsel %vm456_vm13, %v459_v39, %v462_v37  ;;  %v360_v44 = vsel %vm353_vm14, %v356_v40, %v359_v38 }
  0x66   : > { %v464_v45 = vsel %vm350_vm15, nan, %v463_v43  ;;  %v361_v46 = vsel %vm350_vm15, nan, %v360_v44 }
  0x67   : > { %v467_v47 = vmul.f32 2.0, %v464_v45  ;;  %v465_v48 = vmul.f32 2.0, %v361_v46  ;;  %v503_v49 = vcombine.low %v361_v46, %v361_v46  ;;  %v517_v2 = vrot.slane %v361_v46, %v2014_v36 }
  0x68   : > { %v591_v55 = vcombine.low %v464_v45, %v464_v45  ;;  %v605_v21 = vrot.slane %v464_v45, %v2014_v36 }
  0x69   : > { %v468_v52 = vmul.f32 %v467_v47, %v464_v45  ;;  %v466_v53 = vmul.f32 %v465_v48, %v464_v45  ;;  %v510_v54 = vrot.slane %v503_v49, %v2014_v36  ;;  %v519_v1 = vcombine.high %v517_v2, %v517_v2 }
  0x6a   : > { %v681_v56 = vsel %vm678_vm0, %v495_v42, %v517_v2  ;;  %v598_v6 = vrot.slane %v591_v55, %v2014_v36  ;;  %v607_v40 = vcombine.high %v605_v21, %v605_v21 }
  0x6b   : > { %v1801_v57 = vadd.f32 -1.0, %v468_v52  ;;  %v470_v58 = vmul.f32 2.0, %v466_v53  ;;  %v518_v59 = vcombine.high %v510_v54, %v510_v54  ;;  %v532_v60 = vrot.slane %v466_v53, %v2014_v36 }
  0x6c   : > { %v679_v61 = vsel %vm678_vm0, %v488_v41, %v510_v54  ;;  %v525_v62 = vcombine.high %v466_v53, %v466_v53  ;;  %v682_v63 = vsel %vm678_vm0, %v497_v51, %v519_v1  ;;  %v606_v23 = vcombine.high %v598_v6, %v598_v6 }
  0x6d   : > { %v472_v4 = vmul.f32 2.0, %v1801_v57  ;;  %v471_v5 = vmul.f32 %v1801_v57, %v470_v58  ;;  %v680_v7 = vsel %vm678_vm0, %v496_v50, %v518_v59  ;;  %v620_v8 = vrot.slane %v1801_v57, %v2014_v36 }
  0x6e   : > { %v685_v9 = vsel %vm683_vm1, %v680_v7, %v532_v60  ;;  %v540_v10 = vcombine.low %v532_v60, %v532_v60  ;;  %v539_v11 = vrot.slane %v525_v62, %v2014_v36  ;;  %v613_v17 = vcombine.high %v1801_v57, %v1801_v57 }
  0x6f   : > { %v473_v12 = vmul.f32 %v1801_v57, %v472_v4  ;;  %v475_v13 = vmul.f32 2.0, %v471_v5  ;;  %v547_v14 = vcombine.low %v471_v5, %v471_v5  ;;  %v561_v16 = vrot.slane %v471_v5, %v2014_v36 }
  0x70   : > { %v684_v15 = vsel %vm683_vm1, %v679_v61, %v540_v10  ;;  %v687_v18 = vsel %vm683_vm1, %v682_v63, %v539_v11  ;;  %v541_v22 = vcombine.low %v539_v11, %v539_v11  ;;  %v628_v24 = vcombine.low %v620_v8, %v620_v8 }
  0x71   : > { %v1802_v19 = vadd.f32 -1.0, %v473_v12  ;;  %v554_v20 = vrot.slane %v547_v14, %v2014_v36  ;;  %v2037_v25 = vsel %vm688_vm2, %v687_v18, %v561_v16  ;;  %v563_v26 = vcombine.low %v561_v16, %v561_v16 }
  0x72   : > { %v627_v32 = vrot.slane %v613_v17, %v2014_v36  ;;  %v686_v33 = vsel %vm683_vm1, %v681_v56, %v541_v22  ;;  %v1884_v22 = vld [vmem:[%s2479_s1 + $0x8] sm:$0xff]  }
  0x73   : > { %v477_v27 = vmul.f32 2.0, %v1802_v19  ;;  %v476_v28 = vmul.f32 %v1802_v19, %v475_v13  ;;  %v635_v29 = vcombine.low %v1802_v19, %v1802_v19  ;;  %v690_v30 = vsel %vm688_vm2, %v685_v9, %v554_v20 }
  0x74   : > { %v562_v31 = vcombine.low %v554_v20, %v554_v20  ;;  %v649_v3 = vrot.slane %v1802_v19, %v2014_v36  ;;  %v691_v41 = vsel %vm688_vm2, %v686_v33, %v563_v26  ;;  %v629_v48 = vcombine.low %v627_v32, %v627_v32  ;;  %v1888_v26 = vld [vmem:[%s2479_s1 + $0x28] sm:$0xff]   ;;  %v1043_v33 = vld [vmem:[%s2483_s5 + $0x10] sm:$0xff] }
  0x75   : > { %v478_v34 = vmul.f32 %v1802_v19, %v477_v27  ;;  %v576_v35 = vrot.slane %v476_v28, %v2014_v36  ;;  %v642_v37 = vrot.slane %v635_v29, %v2014_v36  ;;  %v569_v38 = vcombine.high %v476_v28, %v476_v28  ;;  %v1889_v27 = vld [vmem:[%s2479_s1 + $0x30] sm:$0xff]   ;;  %v1890_v28 = vld [vmem:[%s2479_s1 + $0x38] sm:$0xff]   ;;  %v1045_v29 = vld [vmem:[%s2483_s5 + $0x20] sm:$0xff] }
  0x76   : > { %v689_v39 = vsel %vm688_vm2, %v684_v15, %v562_v31  ;;  %v651_v49 = vcombine.low %v649_v3, %v649_v3  ;;  %1128 = vperm.xlu1 %1880, %v1045_v29   ;;  %v1046_v31 = vld [vmem:[%s2483_s5 + $0x28] sm:$0xff] }
  0x77   : > { %v1803_v42 = vadd.f32 -1.0, %v478_v34  ;;  %v584_v43 = vcombine.high %v576_v35, %v576_v35  ;;  %v650_v44 = vcombine.low %v642_v37, %v642_v37  ;;  %v693_v45 = vsel %vm678_vm0, %v576_v35, %v598_v6  ;;  %v1042_v34 = vld [vmem:[%s2483_s5 + $0x8] sm:$0xff]  ;;  %v1041_v35 = vld [vmem:[%s2483_s5] sm:$0xff] }
  0x78   : > { %v697_v46 = vsel %vm683_vm1, %v693_v45, %v628_v24  ;;  %v583_v47 = vrot.slane %v569_v38, %v2014_v36  ;;  %v1886_v24 = vld [vmem:[%s2479_s1 + $0x18] sm:$0xff]  }
  0x79   : > { %v664_v50 = vrot.slane %v1803_v42, %v2014_v36  ;;  %v657_v51 = vcombine.high %v1803_v42, %v1803_v42  ;;  %v694_v2 = vsel %vm678_vm0, %v584_v43, %v606_v23  ;;  %v701_v52 = vsel %vm688_vm2, %v697_v46, %v650_v44  ;;  %v1885_v23 = vld [vmem:[%s2479_s1 + $0x10] sm:$0xff]  }
  0x7a   : > { %v698_v53 = vsel %vm683_vm1, %v694_v2, %v620_v8  ;;  %v714_v54 = vpack.c.bf16 %v701_v52, %v689_v39  ;;  %v585_v55 = vcombine.high %v583_v47, %v583_v47  ;;  %v695_v1 = vsel %vm678_vm0, %v583_v47, %v605_v21  ;;  %v1883_v21 = vld [vmem:[%s2479_s1] sm:$0xff]   ;;  %1133 = vperm.xlu1 %1880, %v1046_v31  }
  0x7b   : > { %v672_v56 = vcombine.high %v664_v50, %v664_v50  ;;  %v705_v57 = vsel %vm678_vm0, %v664_v50, 1.0  ;;  %v671_v58 = vrot.slane %v657_v51, %v2014_v36  ;;  %v702_v59 = vsel %vm688_vm2, %v698_v53, %v642_v37 }
  0x7c   : > { %v710_v60 = vsel %vm709_vm3, %v705_v57, 0.0  ;;  %v715_v61 = vpack.c.bf16 %v702_v59, %v690_v30  ;;  %v696_v62 = vsel %vm678_vm0, %v585_v55, %v607_v40  ;;  %v699_v63 = vsel %vm683_vm1, %v695_v1, %v629_v48  ;;  %v1047_v30 = vld [vmem:[%s2483_s5 + $0x30] sm:$0xff] }
  0x7d   : > { %v706_v4 = vsel %vm678_vm0, %v672_v56, 1.0  ;;  %v718_v5 = vpack.c.bf16 %v710_v60, %v710_v60  ;;  %v673_v6 = vcombine.high %v671_v58, %v671_v58  ;;  %v707_v7 = vsel %vm678_vm0, %v671_v58, 1.0  ;;  %1138 = vperm.xlu0 %1879, %v1047_v30  }
  0x7e   : > { %v711_v8 = vsel %vm709_vm3, %v706_v4, 0.0  ;;  %v712_v9 = vsel %vm709_vm3, %v707_v7, 0.0  ;;  %v700_v36 = vsel %vm683_vm1, %v696_v62, %v627_v32  ;;  %v703_v10 = vsel %vm688_vm2, %v699_v63, %v651_v49  ;;  %v1048_v32 = vld [vmem:[%s2483_s5 + $0x38] sm:$0xff] }
  0x7f   : > { %v719_v11 = vpack.c.bf16 %v711_v8, %v711_v8  ;;  %v804_v12 = vsel %vm683_vm1, %v718_v5, 0  ;;  %v708_v13 = vsel %vm678_vm0, %v673_v6, 1.0  ;;  %v720_v14 = vpack.c.bf16 %v712_v9, %v712_v9 }
  0x80   : > { %v713_v15 = vsel %vm709_vm3, %v708_v13, 0.0  ;;  %v704_v16 = vsel %vm688_vm2, %v700_v36, %v649_v3  ;;  %v716_v17 = vpack.c.bf16 %v703_v10, %v691_v41  ;;  %v1044_v3 = vld [vmem:[%s2483_s5 + $0x18] sm:$0xff] }
  0x81   : > { %1812 = vmatprep.subr.msk.bf16.mxu0 %vm683_vm1, %v719_v11  ;;  %v721_v18 = vpack.c.bf16 %v713_v15, %v713_v15  ;;  %v810_v19 = vsel %vm683_vm1, %v720_v14, 0  ;;  %v717_v20 = vpack.c.bf16 %v704_v16, %v2037_v25  ;;  %v1887_v25 = vld [vmem:[%s2479_s1 + $0x20] sm:$0xff]   ;;  %1143 = vperm.xlu0 %1879, %v1048_v32  }
  0x82   : > { %828 = vmatpush1.bf16.msra.mxu0 %v804_v12  ;;  %1123 = vperm.xlu1 %1880, %v1044_v3  }
  0x83   : > { %1821 = vmatprep.subr.msk.bf16.mxu1 %vm683_vm1, %v721_v18  ;;  %829 = vmatprep.subr.bf16.mxu0 %v715_v61 }
  0x84   : > { %941 = vmatpush1.bf16.msra.mxu1 %v810_v19 }
  0x85   : > { %942 = vmatprep.subr.bf16.mxu1 %v717_v20  ;;  %1118 = vperm.xlu0 %1879, %v1043_v33  }
  0x86   : > { %830 = vmatpush1.bf16.msra.mxu0 %v714_v54  ;;  %1113 = vperm.xlu1 %1880, %v1042_v34  }
  0x88   : > { %943 = vmatpush1.bf16.msra.mxu1 %v716_v17 }
  0x89   : > { %1813 = vmatmul.mubr.msk.bf16.vlgmr.msra.gmra.mxu0 %vm778_vm4, %v1883_v21  ;;  %1108 = vperm.xlu0 %1879, %v1041_v35  }
  0x8a   : > { %857 = vmatprep.mubr.bf16.mxu0 %v2485_v0 }
  0x8b   : > { %1822 = vmatmul.mubr.msk.bf16.vlgmr.msra.gmra.mxu1 %vm778_vm4, %v1883_v21 }
  0x8c   : > { %970 = vmatprep.mubr.bf16.mxu1 %v2485_v0 }
  0x91   : > { %1814 = vmatmul.mubr.msk.bf16.gmra.mxu0 %vm778_vm4, %v1884_v22 }
  0x92   : > { %867 = vmatprep.mubr.bf16.mxu0 %v2485_v0 }
  0x93   : > { %1823 = vmatmul.mubr.msk.bf16.gmra.mxu1 %vm778_vm4, %v1884_v22 }
  0x94   : > { %980 = vmatprep.mubr.bf16.mxu1 %v2485_v0 }
  0x99   : > { %1815 = vmatmul.mubr.msk.bf16.gmra.mxu0 %vm778_vm4, %v1885_v23 }
  0x9a   : > { %877 = vmatprep.mubr.bf16.mxu0 %v2485_v0 }
  0x9b   : > { %1824 = vmatmul.mubr.msk.bf16.gmra.mxu1 %vm778_vm4, %v1885_v23 }
  0x9c   : > { %990 = vmatprep.mubr.bf16.mxu1 %v2485_v0 }
  0xa1   : > { %1816 = vmatmul.mubr.msk.bf16.gmra.mxu0 %vm778_vm4, %v1886_v24 }
  0xa2   : > { %887 = vmatprep.mubr.bf16.mxu0 %v2485_v0 }
  0xa3   : > { %1825 = vmatmul.mubr.msk.bf16.gmra.mxu1 %vm778_vm4, %v1886_v24 }
  0xa4   : > { %1000 = vmatprep.mubr.bf16.mxu1 %v2485_v0 }
  0xa9   : > { %1817 = vmatmul.mubr.msk.bf16.gmra.mxu0 %vm778_vm4, %v1887_v25 }
  0xaa   : > { %897 = vmatprep.mubr.bf16.mxu0 %v2485_v0 }
  0xab   : > { %1826 = vmatmul.mubr.msk.bf16.gmra.mxu1 %vm778_vm4, %v1887_v25 }
  0xac   : > { %1010 = vmatprep.mubr.bf16.mxu1 %v2485_v0 }
  0xb1   : > { %1818 = vmatmul.mubr.msk.bf16.gmra.mxu0 %vm778_vm4, %v1888_v26 }
  0xb2   : > { %907 = vmatprep.mubr.bf16.mxu0 %v2485_v0 }
  0xb3   : > { %1827 = vmatmul.mubr.msk.bf16.gmra.mxu1 %vm778_vm4, %v1888_v26 }
  0xb4   : > { %1020 = vmatprep.mubr.bf16.mxu1 %v2485_v0 }
  0xb9   : > { %1819 = vmatmul.mubr.msk.bf16.gmra.mxu0 %vm778_vm4, %v1889_v27 }
  0xba   : > { %917 = vmatprep.mubr.bf16.mxu0 %v2485_v0 }
  0xbb   : > { %1828 = vmatmul.mubr.msk.bf16.gmra.mxu1 %vm778_vm4, %v1889_v27 }
  0xbc   : > { %1030 = vmatprep.mubr.bf16.mxu1 %v2485_v0 }
  0xc1   : > { %1820 = vmatmul.mubr.msk.bf16.gmra.mxu0 %vm778_vm4, %v1890_v28 }
  0xc2   : > { %1211 = vmatprep.mubr.bf16.mxu0 %v2485_v0 }
  0xc3   : > { %1829 = vmatmul.mubr.msk.bf16.gmra.mxu1 %vm778_vm4, %v1890_v28 }
  0xc4   : > { %1284 = vmatprep.mubr.bf16.mxu1 %v2485_v0 }
 0x149   : > { %v2155_v37 = vpop.f32.mrf.mxu0 }
 0x14b   : > { %v2157_v38 = vpop.f32.mrf.mxu0  ;;  %v2159_v39 = vpop.f32.mrf.mxu1 }
 0x14d   : > { %v2161_v40 = vpop.f32.mrf.mxu0  ;;  %v2163_v41 = vpop.f32.mrf.mxu1 }
 0x14f   : > { %v2165_v42 = vpop.f32.mrf.mxu0  ;;  %v2167_v43 = vpop.f32.mrf.mxu1 }
 0x150   : > { %v1055_v3 = vmax.f32 %v2165_v42, 0.0 }
 0x151   : > { %v2169_v44 = vpop.f32.mrf.mxu0  ;;  %v2171_v45 = vpop.f32.mrf.mxu1 }
 0x152   : > { %v1058_v35 = vmax.f32 %v2169_v44, 0.0  ;;  %v1050_v44 = vmax.f32 %v2155_v37, 0.0  ;;  %v1892_v37 = vld [vmem:[%s2480_s2 + $0x8] sm:$0xff]  }
 0x153   : > { %v861_v46 = vpop.f32.mrf.mxu0  ;;  %v2173_v47 = vpop.f32.mrf.mxu1 }
 0x154   : > { %v1059_v27 = vmax.f32 %v861_v46, 0.0  ;;  %v1060_v42 = vmax.f32 %v2173_v47, 0.0 }
 0x155   : > { %v2175_v48 = vpop.f32.mrf.mxu0  ;;  %v2177_v49 = vpop.f32.mrf.mxu1 }
 0x156   : > { %v1062_v30 = vmax.f32 %v2175_v48, 0.0  ;;  %v1061_v33 = vmax.f32 %v2177_v49, 0.0  ;;  %v1053_v49 = vmax.f32 %v2163_v41, 0.0 }
 0x157   : > { %v865_v50 = vpop.f32.mrf.mxu0  ;;  %v2179_v51 = vpop.f32.mrf.mxu1 }
 0x158   : > { %v1063_v20 = vmax.f32 %v865_v50, 0.0  ;;  %v1064_v50 = vmax.f32 %v2179_v51, 0.0  ;;  %v1056_v51 = vmax.f32 %v2167_v43, 0.0  ;;  %v1894_v43 = vld [vmem:[%s2480_s2 + $0x18] sm:$0xff]  }
 0x159   : > { %v869_v2 = vpop.f32.mrf.mxu0  ;;  %v978_v52 = vpop.f32.mrf.mxu1 }
 0x15a   : > { %v1066_v24 = vmax.f32 %v869_v2, 0.0  ;;  %v1065_v28 = vmax.f32 %v978_v52, 0.0  ;;  %v1095_v34 = vpack.c.bf16 %v1063_v20, %v1059_v27  ;;  %v1051_v2 = vmax.f32 %v2157_v38, 0.0 }
 0x15b   : > { %v871_v53 = vpop.f32.mrf.mxu0  ;;  %v982_v54 = vpop.f32.mrf.mxu1  ;;  %v1057_v52 = vmax.f32 %v2171_v45, 0.0  ;;  %v1052_v45 = vmax.f32 %v2159_v39, 0.0  ;;  %v1893_v39 = vld [vmem:[%s2480_s2 + $0x10] sm:$0xff]  }
 0x15c   : > { %v1067_v36 = vmax.f32 %v871_v53, 0.0  ;;  %v1068_v31 = vmax.f32 %v982_v54, 0.0  ;;  %v1097_v48 = vpack.c.bf16 %v1065_v28, %v1061_v33  ;;  %v1054_v53 = vmax.f32 %v2161_v40, 0.0  ;;  %v1891_v40 = vld [vmem:[%s2480_s2] sm:$0xff]  }
 0x15d   : > { %v873_v55 = vpop.f32.mrf.mxu0  ;;  %v984_v1 = vpop.f32.mrf.mxu1  ;;  %v1094_v54 = vpack.c.bf16 %v1062_v30, %v1058_v35  ;;  %v1093_v38 = vpack.c.bf16 %v1057_v52, %v1053_v49  ;;  %v1092_v41 = vpack.c.bf16 %v1056_v51, %v1052_v45 }
 0x15e   : > { %v1070_v17 = vmax.f32 %v873_v55, 0.0  ;;  %v1069_v21 = vmax.f32 %v984_v1, 0.0  ;;  %v1091_v55 = vpack.c.bf16 %v1055_v3, %v1051_v2  ;;  %v1096_v1 = vpack.c.bf16 %v1064_v50, %v1060_v42  ;;  %v1139_v3 = vpop.permute.xlu0 %1138 }
 0x15f   : > { %v875_v56 = vpop.f32.mrf.mxu0  ;;  %v986_v57 = vpop.f32.mrf.mxu1 }
 0x160   : > { %v1071_v7 = vmax.f32 %v875_v56, 0.0  ;;  %v1072_v25 = vmax.f32 %v986_v57, 0.0  ;;  %v1098_v32 = vpack.c.bf16 %v1070_v17, %v1066_v24  ;;  %v1090_v56 = vpack.c.bf16 %v1054_v53, %v1050_v44 }
 0x161   : > { %v879_v58 = vpop.f32.mrf.mxu0  ;;  %v988_v59 = vpop.f32.mrf.mxu1 }
 0x162   : > { %v1074_v10 = vmax.f32 %v879_v58, 0.0  ;;  %v1073_v13 = vmax.f32 %v988_v59, 0.0  ;;  %v1099_v22 = vpack.c.bf16 %v1071_v7, %v1067_v36  ;;  %v1100_v46 = vpack.c.bf16 %v1072_v25, %v1068_v31 }
 0x163   : > { %v881_v60 = vpop.f32.mrf.mxu0  ;;  %v992_v61 = vpop.f32.mrf.mxu1 }
 0x164   : > { %v1075_v8 = vmax.f32 %v881_v60, 0.0  ;;  %v1076_v18 = vmax.f32 %v992_v61, 0.0  ;;  %v1101_v29 = vpack.c.bf16 %v1073_v13, %v1069_v21 }
 0x165   : > { %v883_v62 = vpop.f32.mrf.mxu0  ;;  %v994_v63 = vpop.f32.mrf.mxu1 }
 0x166   : > { %v1078_v4 = vmax.f32 %v883_v62, 0.0  ;;  %v1077_v14 = vmax.f32 %v994_v63, 0.0 }
 0x167   : > { %v885_v5 = vpop.f32.mrf.mxu0  ;;  %v996_v6 = vpop.f32.mrf.mxu1 }
 0x168   : > { %v1079_v9 = vmax.f32 %v885_v5, 0.0  ;;  %v1080_v11 = vmax.f32 %v996_v6, 0.0  ;;  %v1102_v19 = vpack.c.bf16 %v1078_v4, %v1074_v10 }
 0x169   : > { %v998_v12 = vpop.f32.mrf.mxu1  ;;  %v2222_v47 = vpop.f32.mrf.mxu0 }
 0x16a   : > { %v1103_v15 = vpack.c.bf16 %v1079_v9, %v1075_v8  ;;  %v1081_v16 = vmax.f32 %v998_v12, 0.0  ;;  %v1104_v26 = vpack.c.bf16 %v1080_v11, %v1076_v18 }
 0x16b   : > { %v2224_v57 = vpop.f32.mrf.mxu1  ;;  %v2226_v58 = vpop.f32.mrf.mxu0 }
 0x16c   : > { %v1105_v23 = vpack.c.bf16 %v1081_v16, %v1077_v14  ;;  %1187 = vmatprep.subr.bf16.mxu0 %v1103_v15  ;;  %2487 = vst [vmem:[#allocation2_spill] sm:$0xff] %v2224_v57 }
 0x16d   : > { %1188 = vmatpush1.bf16.msra.mxu0 %v1102_v19  ;;  %v2228_v59 = vpop.f32.mrf.mxu1  ;;  %v2230_v60 = vpop.f32.mrf.mxu0 }
 0x16e   : > { %1189 = vmatprep.subr.bf16.mxu0 %v1099_v22  ;;  %1260 = vmatprep.subr.bf16.mxu1 %v1105_v23  ;;  %2488 = vst [vmem:[#allocation3_spill] sm:$0xff] %v2228_v59 }
 0x16f   : > { %1261 = vmatpush1.bf16.msra.mxu1 %v1104_v26  ;;  %v2232_v61 = vpop.f32.mrf.mxu1  ;;  %v2234_v62 = vpop.f32.mrf.mxu0 }
 0x170   : > { %1262 = vmatprep.subr.bf16.mxu1 %v1101_v29  ;;  %2489 = vst [vmem:[#allocation4_spill] sm:$0xff] %v2232_v61 }
 0x171   : > { %1190 = vmatpush1.bf16.msra.mxu0 %v1098_v32  ;;  %v2236_v63 = vpop.f32.mrf.mxu1  ;;  %v2238_v4 = vpop.f32.mrf.mxu0 }
 0x172   : > { %1191 = vmatprep.subr.bf16.mxu0 %v1095_v34  ;;  %2490 = vst [vmem:[#allocation5_spill] sm:$0xff] %v2236_v63  ;;  %v2290_v32 = vpop.permute.xlu1 %1128 }
 0x173   : > { %1263 = vmatpush1.bf16.msra.mxu1 %v1100_v46  ;;  %v2240_v5 = vpop.f32.mrf.mxu1  ;;  %v2242_v6 = vpop.f32.mrf.mxu0 }
 0x174   : > { %1264 = vmatprep.subr.bf16.mxu1 %v1097_v48  ;;  %2491 = vst [vmem:[#allocation6_spill] sm:$0xff] %v2240_v5  ;;  %v1144_v48 = vpop.permute.xlu0 %1143 }
 0x175   : > { %1192 = vmatpush1.bf16.msra.mxu0 %v1094_v54  ;;  %v2244_v7 = vpop.f32.mrf.mxu1  ;;  %v2246_v8 = vpop.f32.mrf.mxu0 }
 0x176   : > { %1193 = vmatprep.subr.bf16.mxu0 %v1091_v55  ;;  %2492 = vst [vmem:[#allocation7_spill] sm:$0xff] %v2244_v7  ;;  %2493 = vst [vmem:[#allocation8_spill] sm:$0xff] %v2246_v8  ;;  %v1134_v52 = vpop.permute.xlu1 %1133 }
 0x177   : > { %1265 = vmatpush1.bf16.msra.mxu1 %v1096_v1  ;;  %v2248_v9 = vpop.f32.mrf.mxu1  ;;  %v2250_v36 = vpop.f32.mrf.mxu0 }
 0x178   : > { %1266 = vmatprep.subr.bf16.mxu1 %v1093_v38  ;;  %2494 = vst [vmem:[#allocation9_spill] sm:$0xff] %v2248_v9  ;;  %2495 = vst [vmem:[#allocation10_spill] sm:$0xff] %v2250_v36  ;;  %v2302_v1 = vpop.permute.xlu0 %1118 }
 0x179   : > { %1194 = vmatpush1.bf16.msra.mxu0 %v1090_v56  ;;  %v2252_v10 = vpop.f32.mrf.mxu1  ;;  %v2254_v11 = vpop.f32.mrf.mxu0 }
 0x17a   : > { %2496 = vst [vmem:[#allocation11_spill] sm:$0xff] %v2252_v10  ;;  %2497 = vst [vmem:[#allocation12_spill] sm:$0xff] %v2254_v11  ;;  %v2300_v51 = vpop.permute.xlu1 %1123 }
 0x17b   : > { %1267 = vmatpush1.bf16.msra.mxu1 %v1092_v41  ;;  %v2256_v12 = vpop.f32.mrf.mxu1  ;;  %v2258_v13 = vpop.f32.mrf.mxu0 }
 0x17c   : > { %1834 = vmatmul.mubr.msk.bf16.vlgmr.msra.gmra.mxu0 %vm1166_vm5, %v1891_v40  ;;  %2498 = vst [vmem:[#allocation13_spill] sm:$0xff] %v2256_v12  ;;  %2499 = vst [vmem:[#allocation14_spill] sm:$0xff] %v2258_v13 }
 0x17d   : > { %1221 = vmatprep.mubr.bf16.mxu0 %v2485_v0  ;;  %v2260_v14 = vpop.f32.mrf.mxu1  ;;  %v2262_v15 = vpop.f32.mrf.mxu0 }
 0x17e   : > { %1838 = vmatmul.mubr.msk.bf16.vlgmr.msra.gmra.mxu1 %vm1166_vm5, %v1891_v40  ;;  %2500 = vst [vmem:[#allocation15_spill] sm:$0xff] %v2260_v14  ;;  %2501 = vst [vmem:[#allocation16_spill] sm:$0xff] %v2262_v15 }
 0x17f   : > { %1294 = vmatprep.mubr.bf16.mxu1 %v2485_v0  ;;  %v2264_v16 = vpop.f32.mrf.mxu1  ;;  %v2266_v17 = vpop.f32.mrf.mxu0 }
 0x180   : > { %2502 = vst [vmem:[#allocation17_spill] sm:$0xff] %v2264_v16  ;;  %2503 = vst [vmem:[#allocation18_spill] sm:$0xff] %v2266_v17 }
 0x181   : > { %v2268_v18 = vpop.f32.mrf.mxu1  ;;  %v2270_v19 = vpop.f32.mrf.mxu0 }
 0x182   : > { %2504 = vst [vmem:[#allocation19_spill] sm:$0xff] %v2268_v18  ;;  %2505 = vst [vmem:[#allocation20_spill] sm:$0xff] %v2270_v19 }
 0x183   : > { %v2272_v20 = vpop.f32.mrf.mxu1  ;;  %v2274_v21 = vpop.f32.mrf.mxu0 }
 0x184   : > { %1835 = vmatmul.mubr.msk.bf16.gmra.mxu0 %vm1166_vm5, %v1892_v37  ;;  %2506 = vst [vmem:[#allocation21_spill] sm:$0xff] %v2272_v20  ;;  %2507 = vst [vmem:[#allocation22_spill] sm:$0xff] %v2274_v21 }
 0x185   : > { %1231 = vmatprep.mubr.bf16.mxu0 %v2485_v0  ;;  %v2276_v22 = vpop.f32.mrf.mxu1  ;;  %v2278_v23 = vpop.f32.mrf.mxu0 }
 0x186   : > { %1839 = vmatmul.mubr.msk.bf16.gmra.mxu1 %vm1166_vm5, %v1892_v37  ;;  %2508 = vst [vmem:[#allocation23_spill] sm:$0xff] %v2276_v22  ;;  %2509 = vst [vmem:[#allocation24_spill] sm:$0xff] %v2278_v23 }
 0x187   : > { %1304 = vmatprep.mubr.bf16.mxu1 %v2485_v0  ;;  %v2280_v24 = vpop.f32.mrf.mxu1  ;;  %v2282_v25 = vpop.f32.mrf.mxu0 }
 0x188   : > { %2510 = vst [vmem:[#allocation25_spill] sm:$0xff] %v2280_v24  ;;  %2511 = vst [vmem:[#allocation26_spill] sm:$0xff] %v2282_v25 }
 0x189   : > { %v2284_v26 = vpop.f32.mrf.mxu1 }
 0x18a   : > { %2512 = vst [vmem:[#allocation27_spill] sm:$0xff] %v2284_v26 }
 0x18c   : > { %1836 = vmatmul.mubr.msk.bf16.gmra.mxu0 %vm1166_vm5, %v1893_v39 }
 0x18d   : > { %1241 = vmatprep.mubr.bf16.mxu0 %v2485_v0 }
 0x18e   : > { %1840 = vmatmul.mubr.msk.bf16.gmra.mxu1 %vm1166_vm5, %v1893_v39  ;;  %v2304_v39 = vpop.permute.xlu1 %1113 }
 0x18f   : > { %1314 = vmatprep.mubr.bf16.mxu1 %v2485_v0 }
 0x194   : > { %1837 = vmatmul.mubr.msk.bf16.gmra.mxu0 %vm1166_vm5, %v1894_v43 }
 0x195   : > { %1445 = vmatprep.mubr.bf16.mxu0 %v2485_v0 }
 0x196   : > { %1841 = vmatmul.mubr.msk.bf16.gmra.mxu1 %vm1166_vm5, %v1894_v43  ;;  %v2306_v43 = vpop.permute.xlu0 %1108 }
 0x197   : > { %1518 = vmatprep.mubr.bf16.mxu1 %v2485_v0 }
 0x23c   : > { %v1213_v27 = vpop.f32.mrf.mxu0 }
 0x23d   : > { %v2315_v9 = vadd.f32 %v1213_v27, %v2306_v43 }
 0x23e   : > { %v1215_v28 = vpop.f32.mrf.mxu0  ;;  %v2286_v29 = vpop.f32.mrf.mxu1 }
 0x23f   : > { %v2318_v12 = vadd.f32 %v1215_v28, %v2306_v43 }
 0x240   : > { %v1217_v30 = vpop.f32.mrf.mxu0  ;;  %v2288_v31 = vpop.f32.mrf.mxu1 }
 0x241   : > { %v2309_v5 = vadd.f32 %v1217_v30, %v2304_v39 }
 0x242   : > { %v1219_v33 = vpop.f32.mrf.mxu0  ;;  %v2292_v34 = vpop.f32.mrf.mxu1 }
 0x243   : > { %v2312_v63 = vadd.f32 %v1219_v33, %v2304_v39 }
 0x244   : > { %v1223_v35 = vpop.f32.mrf.mxu0  ;;  %v2294_v50 = vpop.f32.mrf.mxu1 }
 0x245   : > { %v2324_v14 = vadd.f32 %v1223_v35, %v2302_v1 }
 0x246   : > { %v1225_v46 = vpop.f32.mrf.mxu0  ;;  %v2296_v2 = vpop.f32.mrf.mxu1 }
 0x247   : > { %v1226_v30 = vadd.f32 %v1225_v46, %v2302_v1 }
 0x248   : > { %v1227_v53 = vpop.f32.mrf.mxu0  ;;  %v1298_v42 = vpop.f32.mrf.mxu1 }
 0x249   : > { %v2321_v20 = vadd.f32 %v1227_v53, %v2300_v51  ;;  %v2328_v15 = vadd.f32 %v1298_v42, %v2302_v1 }
 0x24a   : > { %v1229_v54 = vpop.f32.mrf.mxu0  ;;  %v2298_v49 = vpop.f32.mrf.mxu1 }
 0x24b   : > { %v1230_v25 = vadd.f32 %v1229_v54, %v2300_v51 }
 0x24c   : > { %v1233_v55 = vpop.f32.mrf.mxu0  ;;  %v1302_v44 = vpop.f32.mrf.mxu1 }
 0x24d   : > { %v1234_v28 = vadd.f32 %v1233_v55, %v2290_v32  ;;  %v2334_v53 = vadd.f32 %v1302_v44, %v2300_v51 }
 0x24e   : > { %v1235_v38 = vpop.f32.mrf.mxu0  ;;  %v1306_v45 = vpop.f32.mrf.mxu1 }
 0x24f   : > { %v1236_v22 = vadd.f32 %v1235_v38, %v2290_v32 }
 0x250   : > { %v1237_v56 = vpop.f32.mrf.mxu0  ;;  %v1308_v40 = vpop.f32.mrf.mxu1 }
 0x251   : > { %v1342_v36 = vmax.f32 %v1236_v22, 0.0 }
 0x252   : > { %v1239_v41 = vpop.f32.mrf.mxu0  ;;  %v1310_v37 = vpop.f32.mrf.mxu1 }
 0x253   : > { %v1240_v33 = vadd.f32 %v1239_v41, %v1134_v52  ;;  %v1309_v41 = vadd.f32 %v1308_v40, %v2290_v32  ;;  %v1311_v17 = vadd.f32 %v1310_v37, %v1134_v52 }
 0x254   : > { %v1243_v0 = vpop.f32.mrf.mxu0  ;;  %v1312_v57 = vpop.f32.mrf.mxu1 }
 0x255   : > { %v1244_v18 = vadd.f32 %v1243_v0, %v1139_v3  ;;  %v1313_v13 = vadd.f32 %v1312_v57, %v1134_v52  ;;  %v1346_v38 = vmax.f32 %v1240_v33, 0.0  ;;  %v1347_v33 = vmax.f32 %v1311_v17, 0.0 }
 0x256   : > { %v1245_v61 = vpop.f32.mrf.mxu0  ;;  %v1316_v59 = vpop.f32.mrf.mxu1 }
 0x257   : > { %v1246_v24 = vadd.f32 %v1245_v61, %v1139_v3  ;;  %v1238_v61 = vadd.f32 %v1237_v56, %v1134_v52  ;;  %v1349_v0 = vmax.f32 %v1244_v18, 0.0  ;;  %v1301_v18 = vadd.f32 %v2298_v49, %v2300_v51 }
 0x258   : > { %v1247_v16 = vpop.f32.mrf.mxu0  ;;  %v1318_v26 = vpop.f32.mrf.mxu1  ;;  %v1336_v52 = vmax.f32 %v2328_v15, 0.0  ;;  %v1333_v51 = vmax.f32 %v2324_v14, 0.0 }
 0x259   : > { %v1248_v27 = vadd.f32 %v1247_v16, %v1144_v48  ;;  %v1319_v46 = vadd.f32 %v1318_v26, %v1139_v3  ;;  %v1317_v16 = vadd.f32 %v1316_v59, %v1139_v3  ;;  %v1350_v23 = vmax.f32 %v1246_v24, 0.0 }
 0x25a   : > { %v1249_v35 = vpop.f32.mrf.mxu0  ;;  %v1320_v19 = vpop.f32.mrf.mxu1  ;;  %v1348_v26 = vmax.f32 %v1313_v13, 0.0  ;;  %v1374_v3 = vpack.c.bf16 %v1346_v38, %v1342_v36  ;;  %v1344_v24 = vmax.f32 %v1309_v41, 0.0  ;;  %v1293_v13 = vadd.f32 %v2294_v50, %v2304_v39  ;;  %v1898_v41 = vld [vmem:[%s2481_s3 + $0x18] sm:$0xff]  }
 0x25b   : > { %v1250_v10 = vadd.f32 %v1249_v35, %v1144_v48  ;;  %v1321_v42 = vadd.f32 %v1320_v19, %v1144_v48  ;;  %v1353_v11 = vmax.f32 %v1248_v27, 0.0  ;;  %v1352_v7 = vmax.f32 %v1319_v46, 0.0 }
 0x25c   : > { %v1322_v54 = vpop.f32.mrf.mxu1  ;;  %v1307_v19 = vadd.f32 %v1306_v45, %v2290_v32  ;;  %v1345_v35 = vmax.f32 %v1238_v61, 0.0  ;;  %v1351_v40 = vmax.f32 %v1317_v16, 0.0  ;;  %v1337_v36 = vmax.f32 %v2321_v20, 0.0  ;;  %v1049_v61 = vld [vmem:[%s2483_s5] sm:$0x7] }
 0x25d   : > { %v1354_v55 = vmax.f32 %v1250_v10, 0.0  ;;  %v1323_v21 = vadd.f32 %v1322_v54, %v1144_v48  ;;  %v1355_v44 = vmax.f32 %v1321_v42, 0.0  ;;  %v1377_v56 = vpack.c.bf16 %v1353_v11, %v1349_v0  ;;  %v1897_v42 = vld [vmem:[%s2481_s3 + $0x10] sm:$0xff]  }
 0x25e   : > { %v1338_v10 = vmax.f32 %v1230_v25, 0.0  ;;  %v1341_v48 = vmax.f32 %v1234_v28, 0.0  ;;  %v1297_v11 = vadd.f32 %v2296_v2, %v2302_v1  ;;  %v1330_v25 = vmax.f32 %v2312_v63, 0.0 }
 0x25f   : > { %v1378_v8 = vpack.c.bf16 %v1354_v55, %v1350_v23  ;;  %v1356_v57 = vmax.f32 %v1323_v21, 0.0  ;;  %v1379_v22 = vpack.c.bf16 %v1355_v44, %v1351_v40  ;;  %v1376_v21 = vpack.c.bf16 %v1348_v26, %v1344_v24 }
 0x260   : > { %v1334_v23 = vmax.f32 %v1226_v30, 0.0  ;;  %v1373_v17 = vpack.c.bf16 %v1345_v35, %v1341_v48  ;;  %v1289_v32 = vadd.f32 %v2288_v31, %v2306_v43  ;;  %v1339_v49 = vmax.f32 %v1301_v18, 0.0 }
 0x261   : > { %v1380_v59 = vpack.c.bf16 %v1356_v57, %v1352_v7  ;;  %1421 = vmatprep.subr.bf16.mxu0 %v1378_v8  ;;  %v1340_v7 = vmax.f32 %v2334_v53, 0.0  ;;  %v1343_v8 = vmax.f32 %v1307_v19, 0.0  ;;  %v1291_v20 = vadd.f32 %v2292_v34, %v2304_v39 }
 0x262   : > { %1422 = vmatpush1.bf16.msra.mxu0 %v1377_v56  ;;  %v1370_v50 = vpack.c.bf16 %v1338_v10, %v1334_v23  ;;  %v1332_v2 = vmax.f32 %v1293_v13, 0.0  ;;  %v1326_v1 = vmax.f32 %v2318_v12, 0.0  ;;  %v1335_v37 = vmax.f32 %v1297_v11, 0.0 }
 0x263   : > { %1494 = vmatprep.subr.bf16.mxu1 %v1380_v59  ;;  %1423 = vmatprep.subr.bf16.mxu0 %v1374_v3  ;;  %v1375_v45 = vpack.c.bf16 %v1347_v33, %v1343_v8  ;;  %v1372_v63 = vpack.c.bf16 %v1340_v7, %v1336_v52  ;;  %v1329_v31 = vmax.f32 %v2309_v5, 0.0  ;;  %v1287_v30 = vadd.f32 %v2286_v29, %v2306_v43  ;;  %v1895_v5 = vld [vmem:[%s2481_s3] sm:$0xff]  }
 0x264   : > { %1495 = vmatpush1.bf16.msra.mxu1 %v1379_v22  ;;  %v1369_v15 = vpack.c.bf16 %v1337_v36, %v1333_v51  ;;  %v1366_v27 = vpack.c.bf16 %v1330_v25, %v1326_v1  ;;  %v1328_v14 = vmax.f32 %v1289_v32, 0.0  ;;  %v1331_v28 = vmax.f32 %v1291_v20, 0.0  ;;  %v2514_v20 = vld [vmem:[#allocation8_spill] sm:$0xff] }
 0x265   : > { %1496 = vmatprep.subr.bf16.mxu1 %v1376_v21  ;;  %v1325_v34 = vmax.f32 %v2315_v9, 0.0  ;;  %v1371_v39 = vpack.c.bf16 %v1339_v49, %v1335_v37  ;;  %v1327_v12 = vmax.f32 %v1287_v30, 0.0  ;;  %v2513_v43 = vmov 0   ;;  %v1896_v9 = vld [vmem:[%s2481_s3 + $0x8] sm:$0xff]   ;;  %v2517_v37 = vld [vmem:[#allocation18_spill] sm:$0xff] }
 0x266   : > { %1424 = vmatpush1.bf16.msra.mxu0 %v1373_v17  ;;  %v1368_v53 = vpack.c.bf16 %v1332_v2, %v1328_v14  ;;  %v1935_v16 = vmov 1  }
 0x267   : > { %1425 = vmatprep.subr.bf16.mxu0 %v1370_v50  ;;  %v1365_v46 = vpack.c.bf16 %v1329_v31, %v1325_v34  ;;  %v1367_v29 = vpack.c.bf16 %v1331_v28, %v1327_v12  ;;  %1881 = vset.pattern.permute.xlu0 %v1935_v16  ;;  %v2522_v34 = vld [vmem:[#allocation14_spill] sm:$0xff]  ;;  %v2527_v16 = vld [vmem:[#allocation25_spill] sm:$0xff] }
 0x268   : > { %1497 = vmatpush1.bf16.msra.mxu1 %v1375_v45  ;;  %1610 = vperm.xlu0 %1881, %v1049_v61  }
 0x269   : > { %1498 = vmatprep.subr.bf16.mxu1 %v1372_v63  ;;  %v2516_v63 = vld [vmem:[#allocation10_spill] sm:$0xff] }
 0x26a   : > { %1426 = vmatpush1.bf16.msra.mxu0 %v1369_v15  ;;  %v2519_v15 = vld [vmem:[#allocation24_spill] sm:$0xff] }
 0x26b   : > { %1427 = vmatprep.subr.bf16.mxu0 %v1366_v27  ;;  %v2520_v27 = vld [vmem:[#allocation12_spill] sm:$0xff] }
 0x26c   : > { %1499 = vmatpush1.bf16.msra.mxu1 %v1371_v39 }
 0x26d   : > { %1500 = vmatprep.subr.bf16.mxu1 %v1368_v53  ;;  %v2523_v53 = vld [vmem:[#allocation20_spill] sm:$0xff] }
 0x26e   : > { %1428 = vmatpush1.bf16.msra.mxu0 %v1365_v46 }
 0x270   : > { %1501 = vmatpush1.bf16.msra.mxu1 %v1367_v29  ;;  %v2524_v29 = vld [vmem:[#allocation19_spill] sm:$0xff] }
 0x271   : > { %1846 = vmatmul.mubr.msk.bf16.vlgmr.msra.gmra.mxu0 %vm1166_vm5, %v1895_v5 }
 0x272   : > { %1455 = vmatprep.mubr.bf16.mxu0 %v2513_v43 }
 0x273   : > { %1850 = vmatmul.mubr.msk.bf16.vlgmr.msra.gmra.mxu1 %vm1166_vm5, %v1895_v5 }
 0x274   : > { %1528 = vmatprep.mubr.bf16.mxu1 %v2513_v43 }
 0x279   : > { %1847 = vmatmul.mubr.msk.bf16.gmra.mxu0 %vm1166_vm5, %v1896_v9 }
 0x27a   : > { %1465 = vmatprep.mubr.bf16.mxu0 %v2513_v43 }
 0x27b   : > { %1851 = vmatmul.mubr.msk.bf16.gmra.mxu1 %vm1166_vm5, %v1896_v9  ;;  %v2525_v9 = vld [vmem:[#allocation23_spill] sm:$0xff] }
 0x27c   : > { %1538 = vmatprep.mubr.bf16.mxu1 %v2513_v43 }
 0x281   : > { %1848 = vmatmul.mubr.msk.bf16.gmra.mxu0 %vm1166_vm5, %v1897_v42 }
 0x282   : > { %1475 = vmatprep.mubr.bf16.mxu0 %v2513_v43 }
 0x283   : > { %1852 = vmatmul.mubr.msk.bf16.gmra.mxu1 %vm1166_vm5, %v1897_v42 }
 0x284   : > { %1548 = vmatprep.mubr.bf16.mxu1 %v2513_v43 }
 0x289   : > { %1849 = vmatmul.mubr.msk.bf16.gmra.mxu0 %vm1166_vm5, %v1898_v41 }
 0x28a   : > { %1648 = vmatprep.mubr.bf16.mxu0 %v2513_v43 }
 0x28b   : > { %1853 = vmatmul.mubr.msk.bf16.gmra.mxu1 %vm1166_vm5, %v1898_v41  ;;  %v2526_v41 = vld [vmem:[#allocation26_spill] sm:$0xff] }
 0x28c   : > { %1689 = vmatprep.mubr.bf16.mxu1 %v2513_v43 }
 0x331   : > { %v1447_v54 = vpop.f32.mrf.mxu0 }
 0x332   : > { %v2402_v25 = vadd.f32 %v1447_v54, %v2222_v47  ;;  %v2515_v47 = vld [vmem:[#allocation7_spill] sm:$0xff] }
 0x333   : > { %v1449_v55 = vpop.f32.mrf.mxu0  ;;  %v2389_v38 = vpop.f32.mrf.mxu1 }
 0x334   : > { %v2405_v32 = vadd.f32 %v1449_v55, %v2226_v58  ;;  %v2528_v55 = vld [vmem:[#allocation16_spill] sm:$0xff] }
 0x335   : > { %v1451_v0 = vpop.f32.mrf.mxu0  ;;  %v2391_v44 = vpop.f32.mrf.mxu1 }
 0x336   : > { %v2408_v50 = vadd.f32 %v1451_v0, %v2230_v60 }
 0x337   : > { %v1453_v57 = vpop.f32.mrf.mxu0  ;;  %v2393_v26 = vpop.f32.mrf.mxu1 }
 0x338   : > { %v2411_v52 = vadd.f32 %v1453_v57, %v2234_v62  ;;  %v2518_v62 = vld [vmem:[#allocation22_spill] sm:$0xff]  ;;  %v2529_v57 = vld [vmem:[#allocation15_spill] sm:$0xff] }
 0x339   : > { %v1457_v19 = vpop.f32.mrf.mxu0  ;;  %v2395_v35 = vpop.f32.mrf.mxu1 }
 0x33a   : > { %v2414_v49 = vadd.f32 %v1457_v19, %v2238_v4 }
 0x33b   : > { %v1459_v40 = vpop.f32.mrf.mxu0  ;;  %v2397_v56 = vpop.f32.mrf.mxu1 }
 0x33c   : > { %v2417_v51 = vadd.f32 %v1459_v40, %v2242_v6  ;;  %v2521_v6 = vld [vmem:[#allocation11_spill] sm:$0xff]  ;;  %v2530_v40 = vld [vmem:[#allocation21_spill] sm:$0xff] }
 0x33d   : > { %v1461_v59 = vpop.f32.mrf.mxu0  ;;  %v1532_v3 = vpop.f32.mrf.mxu1 }
 0x33e   : > { %v2420_v45 = vadd.f32 %v1461_v59, %v2514_v20  ;;  %v2423_v2 = vadd.f32 %v1532_v3, %v2515_v47 }
 0x33f   : > { %v1463_v24 = vpop.f32.mrf.mxu0  ;;  %v2399_v10 = vpop.f32.mrf.mxu1 }
 0x340   : > { %v1464_v60 = vadd.f32 %v1463_v24, %v2516_v63 }
 0x341   : > { %v1467_v48 = vpop.f32.mrf.mxu0  ;;  %v1536_v33 = vpop.f32.mrf.mxu1 }
 0x342   : > { %v1468_v14 = vadd.f32 %v1467_v48, %v2520_v27  ;;  %v2431_v28 = vadd.f32 %v1536_v33, %v2521_v6  ;;  %v1572_v27 = vmax.f32 %v1464_v60, 0.0  ;;  %v2536_v60 = vld [vmem:[#allocation6_spill] sm:$0xff] }
 0x343   : > { %v1469_v18 = vpop.f32.mrf.mxu0  ;;  %v1540_v22 = vpop.f32.mrf.mxu1 }
 0x344   : > { %v1470_v39 = vadd.f32 %v1469_v18, %v2522_v34  ;;  %v2534_v34 = vld [vmem:[#allocation9_spill] sm:$0xff] }
 0x345   : > { %v1471_v13 = vpop.f32.mrf.mxu0  ;;  %v1542_v21 = vpop.f32.mrf.mxu1 }
 0x346   : > { %v1472_v0 = vadd.f32 %v1471_v13, %v2528_v55  ;;  %v1543_v19 = vadd.f32 %v1542_v21, %v2529_v57  ;;  %v1567_v55 = vmax.f32 %v2414_v49, 0.0  ;;  %v1559_v49 = vmax.f32 %v2402_v25, 0.0  ;;  %v1611_v25 = vpop.permute.xlu0 %1610 }
 0x347   : > { %v1473_v23 = vpop.f32.mrf.mxu0  ;;  %v1544_v7 = vpop.f32.mrf.mxu1 }
 0x348   : > { %v1474_v31 = vadd.f32 %v1473_v23, %v2517_v37  ;;  %v2531_v23 = vld [vmem:[#allocation27_spill] sm:$0xff] }
 0x349   : > { %v1477_v8 = vpop.f32.mrf.mxu0  ;;  %v1546_v36 = vpop.f32.mrf.mxu1 }
 0x34a   : > { %v1478_v12 = vadd.f32 %v1477_v8, %v2523_v53  ;;  %v1547_v43 = vadd.f32 %v1546_v36, %v2524_v29  ;;  %v1580_v48 = vmax.f32 %v1474_v31, 0.0  ;;  %v1576_v36 = vmax.f32 %v1470_v39, 0.0 }
 0x34b   : > { %v1479_v11 = vpop.f32.mrf.mxu0  ;;  %v1550_v17 = vpop.f32.mrf.mxu1  ;;  %v1578_v31 = vmax.f32 %v1543_v19, 0.0  ;;  %v1535_v39 = vadd.f32 %v2399_v10, %v2534_v34  ;;  %v1574_v29 = vmax.f32 %v2431_v28, 0.0  ;;  %v2538_v28 = vld [vmem:[#allocation4_spill] sm:$0xff] }
 0x34c   : > { %v1480_v30 = vadd.f32 %v1479_v11, %v2518_v62  ;;  %v1551_v59 = vadd.f32 %v1550_v17, %v2530_v40  ;;  %v2532_v11 = vld [vmem:[#allocation17_spill] sm:$0xff]  ;;  %v1583_v47 = vmax.f32 %v1478_v12, 0.0 }
 0x34d   : > { %v1481_v58 = vpop.f32.mrf.mxu0  ;;  %v1552_v1 = vpop.f32.mrf.mxu1  ;;  %v1545_v20 = vadd.f32 %v1544_v7, %v2532_v11  ;;  %v2533_v62 = vld [vmem:[#allocation13_spill] sm:$0xff]  ;;  %v1575_v7 = vmax.f32 %v1468_v14, 0.0 }
 0x34e   : > { %v1482_v4 = vadd.f32 %v1481_v58, %v2519_v15  ;;  %v1553_v42 = vadd.f32 %v1552_v1, %v2525_v9  ;;  %v1584_v33 = vmax.f32 %v1480_v30, 0.0  ;;  %v1582_v1 = vmax.f32 %v1547_v43, 0.0 }
 0x34f   : > { %v1483_v46 = vpop.f32.mrf.mxu0  ;;  %v1554_v5 = vpop.f32.mrf.mxu1  ;;  %v1541_v21 = vadd.f32 %v1540_v22, %v2533_v62  ;;  %v1579_v15 = vmax.f32 %v1472_v0, 0.0  ;;  %v1585_v17 = vmax.f32 %v1551_v59, 0.0  ;;  %v1601_v30 = vpack.c.bf16 %v1580_v48, %v1576_v36 }
 0x350   : > { %v1484_v61 = vadd.f32 %v1483_v46, %v2526_v41  ;;  %v1555_v54 = vadd.f32 %v1554_v5, %v2527_v16  ;;  %v1587_v3 = vmax.f32 %v1482_v4, 0.0  ;;  %v1586_v63 = vmax.f32 %v1553_v42, 0.0  ;;  %v2535_v46 = vld [vmem:[#allocation5_spill] sm:$0xff]  ;;  %v2537_v41 = vld [vmem:[#allocation3_spill] sm:$0xff] }
 0x351   : > { %v1556_v24 = vpop.f32.mrf.mxu1  ;;  %v1581_v53 = vmax.f32 %v1545_v20, 0.0  ;;  %v1527_v5 = vadd.f32 %v2395_v35, %v2535_v46  ;;  %v1568_v22 = vmax.f32 %v2417_v51, 0.0  ;;  %v1603_v43 = vpack.c.bf16 %v1582_v1, %v1578_v31 }
 0x352   : > { %v1588_v18 = vmax.f32 %v1484_v61, 0.0  ;;  %v1557_v8 = vadd.f32 %v1556_v24, %v2531_v23  ;;  %v1589_v58 = vmax.f32 %v1555_v54, 0.0  ;;  %v1604_v4 = vpack.c.bf16 %v1587_v3, %v1583_v47 }
 0x353   : > { %v1531_v9 = vadd.f32 %v2397_v56, %v2536_v60  ;;  %v1571_v42 = vmax.f32 %v2420_v45, 0.0  ;;  %v1577_v10 = vmax.f32 %v1541_v21, 0.0  ;;  %v1600_v14 = vpack.c.bf16 %v1579_v15, %v1575_v7 }
 0x354   : > { %v1605_v37 = vpack.c.bf16 %v1588_v18, %v1584_v33  ;;  %v1590_v13 = vmax.f32 %v1557_v8, 0.0  ;;  %v1606_v12 = vpack.c.bf16 %v1589_v58, %v1585_v17  ;;  %v1523_v61 = vadd.f32 %v2391_v44, %v2537_v41  ;;  %v2539_v44 = vld [vmem:[#allocation2_spill] sm:$0xff] }
 0x355   : > { %v1564_v35 = vmax.f32 %v2411_v52, 0.0  ;;  %v1570_v51 = vmax.f32 %v2423_v2, 0.0  ;;  %v1597_v16 = vpack.c.bf16 %v1572_v27, %v1568_v22  ;;  %v1525_v54 = vadd.f32 %v2393_v26, %v2538_v28 }
 0x356   : > { %v1607_v6 = vpack.c.bf16 %v1590_v13, %v1586_v63  ;;  %1624 = vmatprep.subr.bf16.mxu0 %v1605_v37  ;;  %v1573_v56 = vmax.f32 %v1535_v39, 0.0  ;;  %v1602_v0 = vpack.c.bf16 %v1581_v53, %v1577_v10  ;;  %v1560_v45 = vmax.f32 %v2405_v32, 0.0 }
 0x357   : > { %1625 = vmatpush1.bf16.msra.mxu0 %v1604_v4  ;;  %v1566_v57 = vmax.f32 %v1527_v5, 0.0  ;;  %v1599_v19 = vpack.c.bf16 %v1574_v29, %v1570_v51  ;;  %v1521_v52 = vadd.f32 %v2389_v38, %v2539_v44  ;;  %v1563_v2 = vmax.f32 %v2408_v50, 0.0  ;;  %v1591_v50 = vld [vmem:[%s2482_s4] sm:$0x3] }
 0x358   : > { %1626 = vmatprep.subr.bf16.mxu0 %v1601_v30  ;;  %1665 = vmatprep.subr.bf16.mxu1 %v1607_v6  ;;  %v1569_v40 = vmax.f32 %v1531_v9, 0.0  ;;  %v1596_v59 = vpack.c.bf16 %v1571_v42, %v1567_v55  ;;  %v1562_v3 = vmax.f32 %v1523_v61, 0.0  ;;  %v1593_v26 = vpack.c.bf16 %v1564_v35, %v1560_v45 }
 0x359   : > { %1666 = vmatpush1.bf16.msra.mxu1 %v1606_v12  ;;  %v1565_v24 = vmax.f32 %v1525_v54, 0.0  ;;  %v1561_v33 = vmax.f32 %v1521_v52, 0.0  ;;  %v1592_v18 = vpack.c.bf16 %v1563_v2, %v1559_v49 }
 0x35a   : > { %1667 = vmatprep.subr.bf16.mxu1 %v1603_v43  ;;  %v1598_v48 = vpack.c.bf16 %v1573_v56, %v1569_v40  ;;  %v1595_v32 = vpack.c.bf16 %v1566_v57, %v1562_v3 }
 0x35b   : > { %1627 = vmatpush1.bf16.msra.mxu0 %v1600_v14  ;;  %v1594_v38 = vpack.c.bf16 %v1565_v24, %v1561_v33 }
 0x35c   : > { %1628 = vmatprep.subr.bf16.mxu0 %v1597_v16 }
 0x35d   : > { %1668 = vmatpush1.bf16.msra.mxu1 %v1602_v0 }
 0x35e   : > { %1669 = vmatprep.subr.bf16.mxu1 %v1599_v19 }
 0x35f   : > { %1629 = vmatpush1.bf16.msra.mxu0 %v1596_v59 }
 0x360   : > { %1630 = vmatprep.subr.bf16.mxu0 %v1593_v26 }
 0x361   : > { %1670 = vmatpush1.bf16.msra.mxu1 %v1598_v48 }
 0x362   : > { %1671 = vmatprep.subr.bf16.mxu1 %v1595_v32 }
 0x363   : > { %1631 = vmatpush1.bf16.msra.mxu0 %v1592_v18 }
 0x365   : > { %1672 = vmatpush1.bf16.msra.mxu1 %v1594_v38 }
 0x366   : > { %1854 = vmatmul.mubr.msk.bf16.vlgmr.msra.gmra.mxu0 %vm1166_vm5, %v1591_v50 }
 0x368   : > { %1855 = vmatmul.mubr.msk.bf16.vlgmr.msra.gmra.mxu1 %vm1166_vm5, %v1591_v50 }
 0x426   : > { %v1650_v23 = vpop.f32.mrf.mxu0 }
 0x427   : > { %v1651_v8 = vadd.f32 %v1650_v23, %v1611_v25 }
 0x428   : > { %v1691_v36 = vpop.f32.mrf.mxu1  ;;  %v1652_v11 = vpop.f32.mrf.mxu0 }
 0x429   : > { %v1653_v20 = vadd.f32 %v1652_v11, %v1611_v25  ;;  %v1692_v47 = vadd.f32 %v1691_v36, %v1611_v25  ;;  %v1698_v58 = vsub.f32 0.0, %v1651_v8 }
 0x42a   : > { %v1693_v1 = vpop.f32.mrf.mxu1  ;;  %v1654_v63 = vpop.f32.mrf.mxu0 }
 0x42b   : > { %v1694_v37 = vadd.f32 %v1693_v1, %v1611_v25  ;;  %v1699_v13 = vsub.f32 0.0, %v1653_v20  ;;  %v1700_v62 = vsub.f32 0.0, %v1692_v47  ;;  %v1702_v21 = vmul.f32 1.442695, %v1698_v58 }
 0x42c   : > { %v1695_v15 = vpop.f32.mrf.mxu1  ;;  %v1655_v17 = vpop.f32.mrf.mxu0 }
 0x42d   : > { %v1701_v4 = vsub.f32 0.0, %v1694_v37  ;;  %1903 = vpow2.f32 %v1702_v21  ;;  %v1704_v27 = vmul.f32 1.442695, %v1699_v13  ;;  %v1706_v31 = vmul.f32 1.442695, %v1700_v62 }
 0x42e   : > { %v1696_v30 = vpop.f32.mrf.mxu1 }
 0x42f   : > { %1905 = vpow2.f32 %v1704_v27  ;;  %v1708_v6 = vmul.f32 1.442695, %v1701_v4 }
 0x430   : > { %1907 = vpow2.f32 %v1706_v31 }
 0x431   : > { %1909 = vpow2.f32 %v1708_v6 }
 0x43a   : > { %v1904_v34 = vpop.eup %1903 }
 0x43b   : > { %v1710_v39 = vadd.f32 1.0, %v1904_v34 }
 0x43c   : > { %v1906_v7 = vpop.eup %1905 }
 0x43d   : > { %v1908_v53 = vpop.eup %1907  ;;  %v1711_v12 = vadd.f32 1.0, %v1906_v7  ;;  %1911 = vrcp.f32 %v1710_v39 }
 0x43e   : > { %v1910_v46 = vpop.eup %1909  ;;  %v1712_v5 = vadd.f32 1.0, %v1908_v53 }
 0x43f   : > { %v1713_v22 = vadd.f32 1.0, %v1910_v46  ;;  %1913 = vrcp.f32 %v1711_v12 }
 0x440   : > { %1915 = vrcp.f32 %v1712_v5 }
 0x441   : > { %1917 = vrcp.f32 %v1713_v22 }
 0x44a   : > { %v1912_v29 = vpop.eup %1911 }
 0x44c   : > { %v1914_v43 = vpop.eup %1913 }
 0x44d   : > { %v1916_v60 = vpop.eup %1915  ;;  %v1722_v9 = vcombine.low %v1912_v29, %v1914_v43 }
 0x44e   : > { %v1918_v42 = vpop.eup %1917 }
 0x44f   : > { %v1723_v10 = vcombine.low %v1916_v60, %v1918_v42  ;;  %1726 = vst [vmem:[%s253_s15] sm:$0x77] %v1722_v9 }
 0x451   : > { %1727 = vst [vmem:[%s253_s15 + $0x8] sm:$0x77] %v1723_v10 }
 0x452 PF: > { %s16_s21 = sadd.s32 1, %s1925_s21  }
 0x453   : > { %p13_p4 = scmp.ge.s32.totalorder %s16_s21, 4  }
 0x455   :  { %15 = sbr.rel (!%p13_p4) target bundleno = 1 (0x1), region = 74 }

</bundles_post_ra>
